<compile_context>
chip_gen: v6e
topology: v6e:2x2x1
jax: 0.10.0
libtpu: 0.0.40
codegen_flags: <defaults>
</compile_context>

<pallas_src>
import numpy as np

import jax
import jax.numpy as jnp
from jax.experimental import pallas as pl
from jax.experimental.pallas import tpu as pltpu


_POOL_TAPS = ((0, 0), (0, 1), (1, 0), (1, 1))
_TAP = 288          # 8 conv1 channels * 6*6 pooled grid
_TAP_PAD = 384      # tap width padded to a multiple of 128 (lane-aligned slices)
_C2 = 256           # 16 conv2 channels * 4*4  (== PyTorch .view(-1, 256) order)
_HP = 256           # nb_hidden (200) zero-padded to a multiple of 128
_OUT_PAD = 128      # the 2 binary logits live in a lane-dense 128-wide slab
_NB_HIDDEN = 200


# ----------------------------------------------------------------------------
# Fused kernel: both digit subnetworks + binary head in one pallas_call
# ----------------------------------------------------------------------------
def _fused_kernel(x_ref, m1_ref, b1_ref, m2_ref, b2_ref,
                  wfc1_ref, bfc1_ref, wfc2_ref, bfc2_ref,
                  hwfc_ref, hbfc_ref, hwfc2_ref, hbfc2_ref,
                  o_ref, head_acc):
    f32 = jnp.float32
    bf16 = jnp.bfloat16
    d = pl.program_id(1)                                        # digit (0=left, 1=right)

    x = x_ref[...].astype(bf16)                                  # [TB, 392]

    # conv1 + 2x2 max-pool + bias + relu.
    # One merged Toeplitz matmul; tap t occupies lanes [t*384, t*384+288).
    c = jnp.dot(x, m1_ref[0], preferred_element_type=f32)        # [TB, 1536]
    T = _TAP_PAD
    pooled = jnp.maximum(jnp.maximum(c[:, 0 * T:1 * T], c[:, 1 * T:2 * T]),
                         jnp.maximum(c[:, 2 * T:3 * T], c[:, 3 * T:4 * T]))
    pooled = jnp.maximum(pooled + b1_ref[0], 0.0)                # [TB, 384]

    # conv2 + relu (Toeplitz; output lanes co*16 + h*4 + w == NCHW flatten).
    a2 = jnp.dot(pooled.astype(bf16), m2_ref[0],
                 preferred_element_type=f32) + b2_ref[0]
    a2 = jnp.maximum(a2, 0.0)                                    # [TB, 256]

    # fc1 + relu, fc2 (digit logits; 10 valid lanes, never leaves the kernel).
    h = jnp.maximum(jnp.dot(a2.astype(bf16), wfc1_ref[0],
                            preferred_element_type=f32) + bfc1_ref[0], 0.0)   # [TB, 256]
    dig = jnp.dot(h.astype(bf16), wfc2_ref[0],
                  preferred_element_type=f32) + bfc2_ref[0]      # [TB, 10]

    # Binary head, fused: cat(left,right) folded into a per-digit split weight.
    contrib = jnp.dot(dig.astype(bf16), hwfc_ref[0],
                      preferred_element_type=f32)                # [TB, 256]

    @pl.when(d == 0)
    def _():
        head_acc[...] = contrib

    @pl.when(d > 0)
    def _():
        head_acc[...] += contrib

    @pl.when(d == pl.num_programs(1) - 1)
    def _():
        hh = jnp.maximum(head_acc[...] + hbfc_ref[...], 0.0)     # [TB, 256]
        o_ref[...] = (jnp.dot(hh.astype(bf16), hwfc2_ref[...],
                              preferred_element_type=f32) + hbfc2_ref[...])


# ----------------------------------------------------------------------------
# Forward pass (single pallas_call)
# ----------------------------------------------------------------------------
def model_forward(x, params, *, batch_tile=None):
    """x: [B, 2, 14, 14] float32 -> [B, 2] float32."""
    B = x.shape[0]
    if batch_tile is None:
        if B % 256 == 0:
            batch_tile = 256
        elif B % 128 == 0:
            batch_tile = 128
        else:
            batch_tile = B
    TB = batch_tile
    assert B % TB == 0, "batch must be divisible by the batch tile"
    nb = B // TB

    # Pure flatten (no transpose): x2[b, d*196 + h*14 + w]; the digit selection
    # is folded into the Toeplitz row layout of m1.
    x2 = x.reshape(B, 2 * 196)

    # Advisory cost estimate (2*M*K*N per matmul).
    per_digit = 2 * (392 * 4 * _TAP_PAD + _TAP_PAD * _C2 + _C2 * _HP
                     + _HP * 10 + 10 * _HP)
    head = 2 * (_HP * _OUT_PAD)
    flops = B * (2 * per_digit + head)
    weight_bytes = sum(int(np.prod(v.shape)) * v.dtype.itemsize
                       for v in params.values())
    bytes_accessed = int(weight_bytes + x2.size * x2.dtype.itemsize
                         + B * _OUT_PAD * 4)

    out_pad = pl.pallas_call(
        _fused_kernel,
        out_shape=jax.ShapeDtypeStruct((B, _OUT_PAD), jnp.float32),
        grid=(nb, 2),
        in_specs=[
            pl.BlockSpec((TB, 392), lambda b, d: (b, 0)),                 # x
            pl.BlockSpec((1, 392, 4 * _TAP_PAD), lambda b, d: (d, 0, 0)),  # m1
            pl.BlockSpec((1, 1, _TAP_PAD), lambda b, d: (d, 0, 0)),        # b1
            pl.BlockSpec((1, _TAP_PAD, _C2), lambda b, d: (d, 0, 0)),      # m2
            pl.BlockSpec((1, 1, _C2), lambda b, d: (d, 0, 0)),             # b2
            pl.BlockSpec((1, _C2, _HP), lambda b, d: (d, 0, 0)),           # wfc1
            pl.BlockSpec((1, 1, _HP), lambda b, d: (d, 0, 0)),             # bfc1
            pl.BlockSpec((1, _HP, 10), lambda b, d: (d, 0, 0)),            # wfc2
            pl.BlockSpec((1, 1, 10), lambda b, d: (d, 0, 0)),              # bfc2
            pl.BlockSpec((1, 10, _HP), lambda b, d: (d, 0, 0)),            # hwfc
            pl.BlockSpec((1, _HP), lambda b, d: (0, 0)),                   # hbfc
            pl.BlockSpec((_HP, _OUT_PAD), lambda b, d: (0, 0)),            # hwfc2
            pl.BlockSpec((1, _OUT_PAD), lambda b, d: (0, 0)),              # hbfc2
        ],
        out_specs=pl.BlockSpec((TB, _OUT_PAD), lambda b, d: (b, 0)),
        scratch_shapes=[pltpu.VMEM((TB, _HP), jnp.float32)],               # head accumulator
        compiler_params=pltpu.CompilerParams(
            # digit axis carries the head accumulation -> "arbitrary";
            # batch-tile axis is the parallel one (v7x 2-TC split for real batches).
            dimension_semantics=("parallel", "arbitrary"),
            vmem_limit_bytes=32 * 1024 * 1024),                            # fits v7x scoped VMEM
        cost_estimate=pl.CostEstimate(flops=int(flops), transcendentals=0,
                                      bytes_accessed=bytes_accessed),
    )(x2, params["m1"], params["b1"], params["m2"], params["b2"],
      params["wfc1"], params["bfc1"], params["wfc2"], params["bfc2"],
      params["hwfc"], params["hbfc"], params["hwfc2"], params["hbfc2"])

    return out_pad[:, :2]


# ----------------------------------------------------------------------------
# Init-time weight expansion (Toeplitz / pooling-tap matrices; pure numpy)
# ----------------------------------------------------------------------------
def _expand_conv1_pool(w1, b1):
    """w1 [8,1,3,3], b1 [8] -> m1 [196, 4*384] (one tap per 384-lane slab),
       b1big [1, 384].  Valid column layout within a tap: co*36 + i*6 + j."""
    w1 = np.asarray(w1, np.float32)
    b1 = np.asarray(b1, np.float32)
    m1 = np.zeros((196, 4 * _TAP_PAD), np.float32)
    for t, (dy, dx) in enumerate(_POOL_TAPS):
        base = t * _TAP_PAD
        for co in range(8):
            for i in range(6):
                for j in range(6):
                    col = base + co * 36 + i * 6 + j
                    h0, w0 = 2 * i + dy, 2 * j + dx            # conv1 output position
                    for kh in range(3):
                        for kw in range(3):
                            m1[(h0 + kh) * 14 + (w0 + kw), col] += w1[co, 0, kh, kw]
    b1big = np.zeros((1, _TAP_PAD), np.float32)
    b1big[0, :_TAP] = np.repeat(b1, 36)
    return m1, b1big


def _expand_conv2(w2, b2):
    """w2 [16,8,3,3], b2 [16] -> m2 [384, 256] (rows 288..383 zero-pad),
       b2big [1, 256].  Column layout co*16 + h*4 + w == NCHW .view(-1,256)."""
    w2 = np.asarray(w2, np.float32)
    b2 = np.asarray(b2, np.float32)
    m2 = np.zeros((_TAP_PAD, _C2), np.float32)
    for co in range(16):
        for ho in range(4):
            for wo in range(4):
                col = co * 16 + ho * 4 + wo
                for ci in range(8):
                    for kh in range(3):
                        for kw in range(3):
                            m2[ci * 36 + (ho + kh) * 6 + (wo + kw), col] += w2[co, ci, kh, kw]
    b2big = np.repeat(b2, 16)[None, :]
    return m2, b2big


# ----------------------------------------------------------------------------
# Deterministic parameter init (PyTorch-style uniform(+-1/sqrt(fan_in)))
# ----------------------------------------------------------------------------
def _uniform(key, shape, fan_in):
    k = 1.0 / np.sqrt(np.float32(fan_in))
    return jax.random.uniform(key, shape, jnp.float32, -k, k)


def _prep_subnetwork(key, nb_hidden=_NB_HIDDEN):
    ks = jax.random.split(key, 8)
    w1 = _uniform(ks[0], (8, 1, 3, 3), 9)
    b1 = _uniform(ks[1], (8,), 9)
    w2 = _uniform(ks[2], (16, 8, 3, 3), 72)
    b2 = _uniform(ks[3], (16,), 72)
    wfc1 = np.asarray(_uniform(ks[4], (256, nb_hidden), 256))   # rows already in NCHW-flatten order
    bfc1 = np.asarray(_uniform(ks[5], (nb_hidden,), 256))
    wfc2 = np.asarray(_uniform(ks[6], (nb_hidden, 10), nb_hidden))
    bfc2 = np.asarray(_uniform(ks[7], (10,), nb_hidden))

    m1, b1big = _expand_conv1_pool(w1, b1)
    m2, b2big = _expand_conv2(w2, b2)

    # Zero-pad nb_hidden 200 -> 256 so fc activations are full 128-lane multiples.
    wfc1p = np.zeros((256, _HP), np.float32); wfc1p[:, :nb_hidden] = wfc1
    bfc1p = np.zeros((1, _HP), np.float32);  bfc1p[0, :nb_hidden] = bfc1
    wfc2p = np.zeros((_HP, 10), np.float32); wfc2p[:nb_hidden, :] = wfc2
    return dict(m1=m1, b1=b1big, m2=m2, b2=b2big,
                wfc1=wfc1p, bfc1=bfc1p, wfc2=wfc2p, bfc2=bfc2.reshape(1, 10))


def init_model_params(key, nb_hidden=_NB_HIDDEN):
    kl, kr, k1, k2, k3, k4 = jax.random.split(key, 6)
    left = _prep_subnetwork(kl, nb_hidden)
    right = _prep_subnetwork(kr, nb_hidden)                     # weight_sharing=False

    params = {}
    # Fold digit selection into the Toeplitz rows: per-digit matrix is [392, 1536]
    # with the other digit's 196 input rows zero, so x is fed as a flat [B, 392].
    m1 = np.zeros((2, 2 * 196, 4 * _TAP_PAD), np.float32)
    m1[0, :196] = left["m1"]
    m1[1, 196:] = right["m1"]
    params["m1"] = jnp.asarray(m1, jnp.bfloat16)

    for name, dt in (("b1", jnp.float32), ("m2", jnp.bfloat16), ("b2", jnp.float32),
                     ("wfc1", jnp.bfloat16), ("bfc1", jnp.float32),
                     ("wfc2", jnp.bfloat16), ("bfc2", jnp.float32)):
        params[name] = jnp.asarray(np.stack([left[name], right[name]]), dt)

    # Binary head: fc(20 -> nb_hidden), relu, fc2(nb_hidden -> 2).
    # cat(left,right) folded into a per-digit split weight hwfc[d] = W[d*10:(d+1)*10].
    hwfc = np.asarray(_uniform(k1, (20, nb_hidden), 20))
    hbfc = np.asarray(_uniform(k2, (nb_hidden,), 20))
    hwfc2 = np.asarray(_uniform(k3, (nb_hidden, 2), nb_hidden))
    hbfc2 = np.asarray(_uniform(k4, (2,), nb_hidden))

    hwfc_p = np.zeros((2, 10, _HP), np.float32)
    hwfc_p[0, :, :nb_hidden] = hwfc[:10]
    hwfc_p[1, :, :nb_hidden] = hwfc[10:]
    hbfc_p = np.zeros((1, _HP), np.float32);        hbfc_p[0, :nb_hidden] = hbfc
    hwfc2_p = np.zeros((_HP, _OUT_PAD), np.float32); hwfc2_p[:nb_hidden, :2] = hwfc2
    hbfc2_p = np.zeros((1, _OUT_PAD), np.float32);   hbfc2_p[0, :2] = hbfc2

    params["hwfc"] = jnp.asarray(hwfc_p, jnp.bfloat16)
    params["hbfc"] = jnp.asarray(hbfc_p, jnp.float32)
    params["hwfc2"] = jnp.asarray(hwfc2_p, jnp.bfloat16)
    params["hbfc2"] = jnp.asarray(hbfc2_p, jnp.float32)
    return params


if __name__ == "__main__":
    key = jax.random.PRNGKey(0)
    k_params, k_x = jax.random.split(key)
    params = init_model_params(k_params)

    B = 2
    x = jax.random.normal(k_x, (B, 2, 14, 14), dtype=jnp.float32)

    out = jax.jit(model_forward)(x, params)
    out = jax.block_until_ready(out)
    assert out.shape == (B, 2) and out.dtype == jnp.float32
    print("KERNEL_OK")
</pallas_src>

<mosaic_0001>
module attributes {stable_mosaic.version = 11 : i64} {
  func.func @_fused_kernel(%arg0: i32, %arg1: i32, %arg2: memref<2x392xf32, #tpu.memory_space<vmem>>, %arg3: memref<1x392x1536xbf16, #tpu.memory_space<vmem>>, %arg4: memref<1x1x384xf32, #tpu.memory_space<vmem>>, %arg5: memref<1x384x256xbf16, #tpu.memory_space<vmem>>, %arg6: memref<1x1x256xf32, #tpu.memory_space<vmem>>, %arg7: memref<1x256x256xbf16, #tpu.memory_space<vmem>>, %arg8: memref<1x1x256xf32, #tpu.memory_space<vmem>>, %arg9: memref<1x256x10xbf16, #tpu.memory_space<vmem>>, %arg10: memref<1x1x10xf32, #tpu.memory_space<vmem>>, %arg11: memref<1x10x256xbf16, #tpu.memory_space<vmem>>, %arg12: memref<1x256xf32, #tpu.memory_space<vmem>>, %arg13: memref<256x128xbf16, #tpu.memory_space<vmem>>, %arg14: memref<1x128xf32, #tpu.memory_space<vmem>>, %arg15: memref<2x128xf32, #tpu.memory_space<vmem>>, %arg16: memref<2x256xf32, #tpu.memory_space<vmem>>) attributes {dimension_semantics = [#tpu.dimension_semantics<parallel>, #tpu.dimension_semantics<arbitrary>], iteration_bounds = array<i64: 1, 2>, scalar_prefetch = 0 : i64, scratch_operands = 1 : i64, tpu.core_type = #tpu.core_type<tc>, window_params = [{transform_indices = @transform_0, window_bounds = array<i64: 2, 392>}, {transform_indices = @transform_1, window_bounds = array<i64: 1, 392, 1536>}, {transform_indices = @transform_2, window_bounds = array<i64: 1, 1, 384>}, {transform_indices = @transform_3, window_bounds = array<i64: 1, 384, 256>}, {transform_indices = @transform_4, window_bounds = array<i64: 1, 1, 256>}, {transform_indices = @transform_5, window_bounds = array<i64: 1, 256, 256>}, {transform_indices = @transform_6, window_bounds = array<i64: 1, 1, 256>}, {transform_indices = @transform_7, window_bounds = array<i64: 1, 256, 10>}, {transform_indices = @transform_8, window_bounds = array<i64: 1, 1, 10>}, {transform_indices = @transform_9, window_bounds = array<i64: 1, 10, 256>}, {pipeline_mode = #tpu.pipeline_mode<synchronous>, transform_indices = @transform_10, window_bounds = array<i64: 1, 256>}, {pipeline_mode = #tpu.pipeline_mode<synchronous>, transform_indices = @transform_11, window_bounds = array<i64: 256, 128>}, {pipeline_mode = #tpu.pipeline_mode<synchronous>, transform_indices = @transform_12, window_bounds = array<i64: 1, 128>}, {transform_indices = @transform_13, window_bounds = array<i64: 2, 128>}]} {
    %c0 = arith.constant 0 : index
    %c0_0 = arith.constant 0 : index
    %0 = vector.load %arg2[%c0, %c0_0] : memref<2x392xf32, #tpu.memory_space<vmem>>, vector<2x392xf32>
    %1 = arith.truncf %0 : vector<2x392xf32> to vector<2x392xbf16>
    %c0_1 = arith.constant 0 : index
    %c0_2 = arith.constant 0 : index
    %c0_3 = arith.constant 0 : index
    %2 = vector.load %arg3[%c0_1, %c0_2, %c0_3] : memref<1x392x1536xbf16, #tpu.memory_space<vmem>>, vector<1x392x1536xbf16>
    %3 = vector.shape_cast %2 : vector<1x392x1536xbf16> to vector<392x1536xbf16>
    %cst = arith.constant dense<0.000000e+00> : vector<2x1536xf32>
    %4 = tpu.matmul %1, %3, %cst {dimension_numbers = #tpu.dot_dimension_numbers<[1], [0], [0], [1], [0, 0, 1, 1], [], []>} : vector<2x392xbf16>, vector<392x1536xbf16>, vector<2x1536xf32> -> vector<2x1536xf32>
    %5 = vector.extract_strided_slice %4 {offsets = [0, 0], sizes = [2, 384], strides = [1, 1]} : vector<2x1536xf32> to vector<2x384xf32>
    %6 = vector.extract_strided_slice %4 {offsets = [0, 384], sizes = [2, 384], strides = [1, 1]} : vector<2x1536xf32> to vector<2x384xf32>
    %7 = arith.maximumf %5, %6 : vector<2x384xf32>
    %8 = vector.extract_strided_slice %4 {offsets = [0, 768], sizes = [2, 384], strides = [1, 1]} : vector<2x1536xf32> to vector<2x384xf32>
    %9 = vector.extract_strided_slice %4 {offsets = [0, 1152], sizes = [2, 384], strides = [1, 1]} : vector<2x1536xf32> to vector<2x384xf32>
    %10 = arith.maximumf %8, %9 : vector<2x384xf32>
    %11 = arith.maximumf %7, %10 : vector<2x384xf32>
    %c0_4 = arith.constant 0 : index
    %c0_5 = arith.constant 0 : index
    %c0_6 = arith.constant 0 : index
    %12 = vector.load %arg4[%c0_4, %c0_5, %c0_6] : memref<1x1x384xf32, #tpu.memory_space<vmem>>, vector<1x1x384xf32>
    %13 = vector.shape_cast %12 : vector<1x1x384xf32> to vector<1x384xf32>
    %14 = vector.broadcast %13 : vector<1x384xf32> to vector<2x384xf32>
    %15 = arith.addf %11, %14 : vector<2x384xf32>
    %cst_7 = arith.constant 0.000000e+00 : f32
    %16 = vector.broadcast %cst_7 : f32 to vector<2x384xf32>
    %17 = arith.maximumf %15, %16 : vector<2x384xf32>
    %18 = arith.truncf %17 : vector<2x384xf32> to vector<2x384xbf16>
    %c0_8 = arith.constant 0 : index
    %c0_9 = arith.constant 0 : index
    %c0_10 = arith.constant 0 : index
    %19 = vector.load %arg5[%c0_8, %c0_9, %c0_10] : memref<1x384x256xbf16, #tpu.memory_space<vmem>>, vector<1x384x256xbf16>
    %20 = vector.shape_cast %19 : vector<1x384x256xbf16> to vector<384x256xbf16>
    %cst_11 = arith.constant dense<0.000000e+00> : vector<2x256xf32>
    %21 = tpu.matmul %18, %20, %cst_11 {dimension_numbers = #tpu.dot_dimension_numbers<[1], [0], [0], [1], [0, 0, 1, 1], [], []>} : vector<2x384xbf16>, vector<384x256xbf16>, vector<2x256xf32> -> vector<2x256xf32>
    %c0_12 = arith.constant 0 : index
    %c0_13 = arith.constant 0 : index
    %c0_14 = arith.constant 0 : index
    %22 = vector.load %arg6[%c0_12, %c0_13, %c0_14] : memref<1x1x256xf32, #tpu.memory_space<vmem>>, vector<1x1x256xf32>
    %23 = vector.shape_cast %22 : vector<1x1x256xf32> to vector<1x256xf32>
    %24 = vector.broadcast %23 : vector<1x256xf32> to vector<2x256xf32>
    %25 = arith.addf %21, %24 : vector<2x256xf32>
    %cst_15 = arith.constant 0.000000e+00 : f32
    %26 = vector.broadcast %cst_15 : f32 to vector<2x256xf32>
    %27 = arith.maximumf %25, %26 : vector<2x256xf32>
    %28 = arith.truncf %27 : vector<2x256xf32> to vector<2x256xbf16>
    %c0_16 = arith.constant 0 : index
    %c0_17 = arith.constant 0 : index
    %c0_18 = arith.constant 0 : index
    %29 = vector.load %arg7[%c0_16, %c0_17, %c0_18] : memref<1x256x256xbf16, #tpu.memory_space<vmem>>, vector<1x256x256xbf16>
    %30 = vector.shape_cast %29 : vector<1x256x256xbf16> to vector<256x256xbf16>
    %cst_19 = arith.constant dense<0.000000e+00> : vector<2x256xf32>
    %31 = tpu.matmul %28, %30, %cst_19 {dimension_numbers = #tpu.dot_dimension_numbers<[1], [0], [0], [1], [0, 0, 1, 1], [], []>} : vector<2x256xbf16>, vector<256x256xbf16>, vector<2x256xf32> -> vector<2x256xf32>
    %c0_20 = arith.constant 0 : index
    %c0_21 = arith.constant 0 : index
    %c0_22 = arith.constant 0 : index
    %32 = vector.load %arg8[%c0_20, %c0_21, %c0_22] : memref<1x1x256xf32, #tpu.memory_space<vmem>>, vector<1x1x256xf32>
    %33 = vector.shape_cast %32 : vector<1x1x256xf32> to vector<1x256xf32>
    %34 = vector.broadcast %33 : vector<1x256xf32> to vector<2x256xf32>
    %35 = arith.addf %31, %34 : vector<2x256xf32>
    %cst_23 = arith.constant 0.000000e+00 : f32
    %36 = vector.broadcast %cst_23 : f32 to vector<2x256xf32>
    %37 = arith.maximumf %35, %36 : vector<2x256xf32>
    %38 = arith.truncf %37 : vector<2x256xf32> to vector<2x256xbf16>
    %c0_24 = arith.constant 0 : index
    %c0_25 = arith.constant 0 : index
    %c0_26 = arith.constant 0 : index
    %39 = vector.load %arg9[%c0_24, %c0_25, %c0_26] : memref<1x256x10xbf16, #tpu.memory_space<vmem>>, vector<1x256x10xbf16>
    %40 = vector.shape_cast %39 : vector<1x256x10xbf16> to vector<256x10xbf16>
    %cst_27 = arith.constant dense<0.000000e+00> : vector<2x10xf32>
    %41 = tpu.matmul %38, %40, %cst_27 {dimension_numbers = #tpu.dot_dimension_numbers<[1], [0], [0], [1], [0, 0, 1, 1], [], []>} : vector<2x256xbf16>, vector<256x10xbf16>, vector<2x10xf32> -> vector<2x10xf32>
    %c0_28 = arith.constant 0 : index
    %c0_29 = arith.constant 0 : index
    %c0_30 = arith.constant 0 : index
    %42 = vector.load %arg10[%c0_28, %c0_29, %c0_30] : memref<1x1x10xf32, #tpu.memory_space<vmem>>, vector<1x1x10xf32>
    %43 = vector.shape_cast %42 : vector<1x1x10xf32> to vector<1x10xf32>
    %44 = vector.broadcast %43 : vector<1x10xf32> to vector<2x10xf32>
    %45 = arith.addf %41, %44 : vector<2x10xf32>
    %46 = arith.truncf %45 : vector<2x10xf32> to vector<2x10xbf16>
    %c0_31 = arith.constant 0 : index
    %c0_32 = arith.constant 0 : index
    %c0_33 = arith.constant 0 : index
    %47 = vector.load %arg11[%c0_31, %c0_32, %c0_33] : memref<1x10x256xbf16, #tpu.memory_space<vmem>>, vector<1x10x256xbf16>
    %48 = vector.shape_cast %47 : vector<1x10x256xbf16> to vector<10x256xbf16>
    %cst_34 = arith.constant dense<0.000000e+00> : vector<2x256xf32>
    %49 = tpu.matmul %46, %48, %cst_34 {dimension_numbers = #tpu.dot_dimension_numbers<[1], [0], [0], [1], [0, 0, 1, 1], [], []>} : vector<2x10xbf16>, vector<10x256xbf16>, vector<2x256xf32> -> vector<2x256xf32>
    %c0_i32 = arith.constant 0 : i32
    %50 = arith.cmpi eq, %arg1, %c0_i32 : i32
    %51 = arith.extui %50 : i1 to i32
    %c0_i32_35 = arith.constant 0 : i32
    %52 = arith.cmpi ne, %51, %c0_i32_35 : i32
    scf.if %52 {
      %c0_39 = arith.constant 0 : index
      %c0_40 = arith.constant 0 : index
      %59 = vector.load %arg16[%c0_39, %c0_40] : memref<2x256xf32, #tpu.memory_space<vmem>>, vector<2x256xf32>
      tpu.vector_store %arg16[%c0_39, %c0_40], %49 {strides = array<i32>} : memref<2x256xf32, #tpu.memory_space<vmem>>, vector<2x256xf32>,
    } else {
    }
    %c0_i32_36 = arith.constant 0 : i32
    %53 = arith.cmpi sgt, %arg1, %c0_i32_36 : i32
    %54 = arith.extui %53 : i1 to i32
    %c0_i32_37 = arith.constant 0 : i32
    %55 = arith.cmpi ne, %54, %c0_i32_37 : i32
    scf.if %55 {
      %c0_39 = arith.constant 0 : index
      %c0_40 = arith.constant 0 : index
      %59 = vector.load %arg16[%c0_39, %c0_40] : memref<2x256xf32, #tpu.memory_space<vmem>>, vector<2x256xf32>
      %60 = arith.addf %59, %49 : vector<2x256xf32>
      %c0_41 = arith.constant 0 : index
      %c0_42 = arith.constant 0 : index
      %61 = vector.load %arg16[%c0_41, %c0_42] : memref<2x256xf32, #tpu.memory_space<vmem>>, vector<2x256xf32>
      tpu.vector_store %arg16[%c0_41, %c0_42], %60 {strides = array<i32>} : memref<2x256xf32, #tpu.memory_space<vmem>>, vector<2x256xf32>,
    } else {
    }
    %c1_i32 = arith.constant 1 : i32
    %56 = arith.cmpi eq, %arg1, %c1_i32 : i32
    %57 = arith.extui %56 : i1 to i32
    %c0_i32_38 = arith.constant 0 : i32
    %58 = arith.cmpi ne, %57, %c0_i32_38 : i32
    scf.if %58 {
      %c0_39 = arith.constant 0 : index
      %c0_40 = arith.constant 0 : index
      %59 = vector.load %arg16[%c0_39, %c0_40] : memref<2x256xf32, #tpu.memory_space<vmem>>, vector<2x256xf32>
      %c0_41 = arith.constant 0 : index
      %c0_42 = arith.constant 0 : index
      %60 = vector.load %arg12[%c0_41, %c0_42] : memref<1x256xf32, #tpu.memory_space<vmem>>, vector<1x256xf32>
      %61 = vector.broadcast %60 : vector<1x256xf32> to vector<2x256xf32>
      %62 = arith.addf %59, %61 : vector<2x256xf32>
      %cst_43 = arith.constant 0.000000e+00 : f32
      %63 = vector.broadcast %cst_43 : f32 to vector<2x256xf32>
      %64 = arith.maximumf %62, %63 : vector<2x256xf32>
      %65 = arith.truncf %64 : vector<2x256xf32> to vector<2x256xbf16>
      %c0_44 = arith.constant 0 : index
      %c0_45 = arith.constant 0 : index
      %66 = vector.load %arg13[%c0_44, %c0_45] : memref<256x128xbf16, #tpu.memory_space<vmem>>, vector<256x128xbf16>
      %cst_46 = arith.constant dense<0.000000e+00> : vector<2x128xf32>
      %67 = tpu.matmul %65, %66, %cst_46 {dimension_numbers = #tpu.dot_dimension_numbers<[1], [0], [0], [1], [0, 0, 1, 1], [], []>} : vector<2x256xbf16>, vector<256x128xbf16>, vector<2x128xf32> -> vector<2x128xf32>
      %c0_47 = arith.constant 0 : index
      %c0_48 = arith.constant 0 : index
      %68 = vector.load %arg14[%c0_47, %c0_48] : memref<1x128xf32, #tpu.memory_space<vmem>>, vector<1x128xf32>
      %69 = vector.broadcast %68 : vector<1x128xf32> to vector<2x128xf32>
      %70 = arith.addf %67, %69 : vector<2x128xf32>
      %c0_49 = arith.constant 0 : index
      %c0_50 = arith.constant 0 : index
      %71 = vector.load %arg15[%c0_49, %c0_50] : memref<2x128xf32, #tpu.memory_space<vmem>>, vector<2x128xf32>
      tpu.vector_store %arg15[%c0_49, %c0_50], %70 {strides = array<i32>} : memref<2x128xf32, #tpu.memory_space<vmem>>, vector<2x128xf32>,
    } else {
    }
    return
  }
  func.func @transform_0(%arg0: i32, %arg1: i32) -> (i32, i32) {
    %c0_i32 = arith.constant 0 : i32
    %c0_i32_0 = arith.constant 0 : i32
    return %arg0, %c0_i32 : i32, i32
  }
  func.func @transform_1(%arg0: i32, %arg1: i32) -> (i32, i32, i32) {
    %c0_i32 = arith.constant 0 : i32
    %c0_i32_0 = arith.constant 0 : i32
    %c0_i32_1 = arith.constant 0 : i32
    return %arg1, %c0_i32, %c0_i32_0 : i32, i32, i32
  }
  func.func @transform_2(%arg0: i32, %arg1: i32) -> (i32, i32, i32) {
    %c0_i32 = arith.constant 0 : i32
    %c0_i32_0 = arith.constant 0 : i32
    %c0_i32_1 = arith.constant 0 : i32
    return %arg1, %c0_i32, %c0_i32_0 : i32, i32, i32
  }
  func.func @transform_3(%arg0: i32, %arg1: i32) -> (i32, i32, i32) {
    %c0_i32 = arith.constant 0 : i32
    %c0_i32_0 = arith.constant 0 : i32
    %c0_i32_1 = arith.constant 0 : i32
    return %arg1, %c0_i32, %c0_i32_0 : i32, i32, i32
  }
  func.func @transform_4(%arg0: i32, %arg1: i32) -> (i32, i32, i32) {
    %c0_i32 = arith.constant 0 : i32
    %c0_i32_0 = arith.constant 0 : i32
    %c0_i32_1 = arith.constant 0 : i32
    return %arg1, %c0_i32, %c0_i32_0 : i32, i32, i32
  }
  func.func @transform_5(%arg0: i32, %arg1: i32) -> (i32, i32, i32) {
    %c0_i32 = arith.constant 0 : i32
    %c0_i32_0 = arith.constant 0 : i32
    %c0_i32_1 = arith.constant 0 : i32
    return %arg1, %c0_i32, %c0_i32_0 : i32, i32, i32
  }
  func.func @transform_6(%arg0: i32, %arg1: i32) -> (i32, i32, i32) {
    %c0_i32 = arith.constant 0 : i32
    %c0_i32_0 = arith.constant 0 : i32
    %c0_i32_1 = arith.constant 0 : i32
    return %arg1, %c0_i32, %c0_i32_0 : i32, i32, i32
  }
  func.func @transform_7(%arg0: i32, %arg1: i32) -> (i32, i32, i32) {
    %c0_i32 = arith.constant 0 : i32
    %c0_i32_0 = arith.constant 0 : i32
    %c0_i32_1 = arith.constant 0 : i32
    return %arg1, %c0_i32, %c0_i32_0 : i32, i32, i32
  }
  func.func @transform_8(%arg0: i32, %arg1: i32) -> (i32, i32, i32) {
    %c0_i32 = arith.constant 0 : i32
    %c0_i32_0 = arith.constant 0 : i32
    %c0_i32_1 = arith.constant 0 : i32
    return %arg1, %c0_i32, %c0_i32_0 : i32, i32, i32
  }
  func.func @transform_9(%arg0: i32, %arg1: i32) -> (i32, i32, i32) {
    %c0_i32 = arith.constant 0 : i32
    %c0_i32_0 = arith.constant 0 : i32
    %c0_i32_1 = arith.constant 0 : i32
    return %arg1, %c0_i32, %c0_i32_0 : i32, i32, i32
  }
  func.func @transform_10(%arg0: i32, %arg1: i32) -> (i32, i32) {
    %c0_i32 = arith.constant 0 : i32
    %c0_i32_0 = arith.constant 0 : i32
    %c0_i32_1 = arith.constant 0 : i32
    return %c0_i32, %c0_i32_0 : i32, i32
  }
  func.func @transform_11(%arg0: i32, %arg1: i32) -> (i32, i32) {
    %c0_i32 = arith.constant 0 : i32
    %c0_i32_0 = arith.constant 0 : i32
    %c0_i32_1 = arith.constant 0 : i32
    return %c0_i32, %c0_i32_0 : i32, i32
  }
  func.func @transform_12(%arg0: i32, %arg1: i32) -> (i32, i32) {
    %c0_i32 = arith.constant 0 : i32
    %c0_i32_0 = arith.constant 0 : i32
    %c0_i32_1 = arith.constant 0 : i32
    return %c0_i32, %c0_i32_0 : i32, i32
  }
  func.func @transform_13(%arg0: i32, %arg1: i32) -> (i32, i32) {
    %c0_i32 = arith.constant 0 : i32
    %c0_i32_0 = arith.constant 0 : i32
    return %arg0, %c0_i32 : i32, i32
  }
}

</mosaic_0001>

<bundles_post_ra>
// kernel: model_forward.1
= control target key start
LH: loop header
LB: loop body
LE: loop exit
PB: predicated region body
PF: predicated region fallthrough
CT: control target
= control target key end

     0   :  { %s7053_s0 = inlined_call_operand.vmem [shape: f32[2,392], index: 0, kind: input, shape index: {}]   ;;  %s7054_s1 = inlined_call_operand.hbm [shape: bf16[2,392,1536], index: 1, kind: input, shape index: {}]   ;;  %s7055_s2 = inlined_call_operand.hbm [shape: f32[2,1,384], index: 2, kind: input, shape index: {}]   ;;  %s7056_s3 = inlined_call_operand.hbm [shape: bf16[2,384,256], index: 3, kind: input, shape index: {}]   ;;  %s7057_s4 = inlined_call_operand.hbm [shape: f32[2,1,256], index: 4, kind: input, shape index: {}]   ;;  %s7058_s5 = inlined_call_operand.hbm [shape: bf16[2,256,256], index: 5, kind: input, shape index: {}]   ;;  %s7059_s6 = inlined_call_operand.hbm [shape: f32[2,1,256], index: 6, kind: input, shape index: {}]   ;;  %s7060_s7 = inlined_call_operand.vmem [shape: bf16[2,256,10], index: 7, kind: input, shape index: {}]   ;;  %s7061_s8 = inlined_call_operand.hbm [shape: f32[2,1,10], index: 8, kind: input, shape index: {}]   ;;  %s7062_s9 = inlined_call_operand.vmem [shape: bf16[2,10,256], index: 9, kind: input, shape index: {}]   ;;  %s7063_s10 = inlined_call_operand.hbm [shape: f32[1,256], index: 10, kind: input, shape index: {}]   ;;  %s7064_s11 = inlined_call_operand.hbm [shape: bf16[256,128], index: 11, kind: input, shape index: {}]   ;;  %s7065_s12 = inlined_call_operand.hbm [shape: f32[1,128], index: 12, kind: input, shape index: {}]   ;;  %s7066_s13 = inlined_call_operand.hbm [shape: f32[2,128], index: 13, kind: output, shape index: {}]  }
   0x1   :  { %7082 = sst [smem:[#allocation34_spill]] %s7053_s0 }
   0x2   :  { %7083 = sst [smem:[#allocation35_spill]] %s7054_s1 }
   0x3   :  { %7084 = sst [smem:[#allocation36_spill]] %s7055_s2 }
   0x4   :  { %7085 = sst [smem:[#allocation37_spill]] %s7057_s4 }
   0x5   :  { %7086 = sst [smem:[#allocation38_spill]] %s7060_s7 }
   0x6   :  { %7087 = sst [smem:[#allocation39_spill]] %s7062_s9 }
   0x7   :  { %7088 = sst [smem:[#allocation40_spill]] %s7063_s10 }
   0x8   :  { %7089 = sst [smem:[#allocation41_spill]] %s7066_s13 }
   0x9   :  { %18 = vsyncpa [#allocation4], 0 }
   0xa   :  { %20 = vsyncpa [#allocation4 + $0x1], 0 }
   0xb   :  { %21 = vsyncpa [#allocation7], 0 }
   0xc   :  { %23 = vsyncpa [#allocation7 + $0x1], 0 }
   0xd   :  { %24 = vsyncpa [#allocation10], 0 }
   0xe   :  { %26 = vsyncpa [#allocation10 + $0x1], 0 }
   0xf   :  { %27 = vsyncpa [#allocation13], 0 }
  0x10   :  { %29 = vsyncpa [#allocation13 + $0x1], 0 }
  0x11   :  { %30 = vsyncpa [#allocation16], 0 }
  0x12   :  { %31 = vsyncpa [#allocation19], 0 }
  0x13   :  { %32 = vsyncpa [#allocation5], 0  ;;  %s6250_s25 = smov 0   ;;  %s6252_s26 = smov 0  }
  0x14   :  { %s6254_s27 = smov 0   ;;  %s6256_s28 = smov 0  }
  0x15   :  { %s6258_s29 = smov 0   ;;  %s6260_s30 = smov 0  }
  0x16 LB: > { %7090 = sst [smem:[#allocation28_spill]] %s6143_s26  ;;  %s6279_s14 = sadd.s32 4294967295, %s6159_s30   ;;  %s6159_s30 = sphi %s6260_s30, %s38_s30   ;;  %s6155_s29 = sphi %s6258_s29, %s7133_s29   ;;  %s6151_s28 = sphi %s6256_s28, %s7132_s28   ;;  %s6147_s27 = sphi %s6254_s27, %s7131_s27   ;;  %s6143_s26 = sphi %s6252_s26, %s7130_s26   ;;  %s6139_s25 = sphi %s6250_s25, %s7128_s25  }
  0x17   : > { %7091 = sst [smem:[#allocation29_spill]] %s6151_s28  ;;  %p90_p0 = scmp.ne.s32.totalorder %s6147_s27, %s6143_s26 }
  0x18   : > { %7092 = sst [smem:[#allocation30_spill]] %s6159_s30  ;;  %p91_p1 = scmp.eq.s32.totalorder %s6159_s30, 0 }
  0x19   : > { %7093 = sst [smem:[#allocation31_spill]] %s6279_s14  ;;  %p96_p2 = scmp.ne.s32.totalorder %s6143_s26, %s6139_s25 }
  0x1a   : > { %p7067_p3 = scmp.eq.s32.totalorder %s6279_s14, 0  ;;  %p92_p4 = por %p91_p1, %p90_p0 }
  0x1b   : > { %p4530_p5 = scmp.ge.s32.totalorder %s6159_s30, 1  ;;  %p404_p7 = scmp.lt.s32.totalorder %s6159_s30, 3 }
  0x1c   : > { %p6290_p6 = por %p7067_p3, %p96_p2  ;;  %s6161_s18 = smov [#allocation15]  }
  0x1d   : > { %p6295_p8 = pnand %p4530_p5, %p404_p7  ;;  %s425_s19 = sshll.u32 %s6161_s18, 4  ;;  %s426_s19 = int_to_ptr.vmem [resolvable:$true] %s425_s19 }
  0x1e   : > { %s7094_s16 = scalar_select %p6290_p6, 1, 0 }
  0x1f   : > { %s7096_s17 = scalar_select %p6295_p8, 1, 0 }
  0x20   : > { %7095 = sst [smem:[#allocation32_spill]] %s7094_s16  ;;  %p5086_p9 = pneg %p6295_p8 }
  0x21   : > { %p5121_p10 = scmp.lt.s32.totalorder %s6159_s30, 2  ;;  %s6303_s20 = sand.u32 1, %s6147_s27  }
  0x22   : > { %p6307_p11 = pnand %p5086_p9, %p7067_p3  ;;  %s6316_s23 = sand.u32 1, %s6159_s30  }
  0x23   : > { %p6311_p12 = pnand %p5121_p10, %p92_p4  ;;  %s5798_s24 = scalar_lea.vmem %s426_s19, 32 }
  0x24   : > { %p5789_p13 = pneg %p6307_p11  ;;  %p5799_p0 = scmp.ne.s32.totalorder %s426_s19, %s5798_s24 }
  0x25   : > { %p5806_p5 = scmp.lt.s32.totalorder %s426_s19, %s426_s19  ;;  %p5807_p7 = scmp.lt.s32.totalorder %s5798_s24, %s5798_s24 }
  0x26   : > { %p5801_p1 = pnand %p5799_p0, %p5789_p13 }
  0x27   : > { %p5808_p9 = por %p5807_p7, %p5806_p5 }
  0x28   : > { %p5802_p2 = pneg %p5801_p1 }
  0x2a   : > { %p5809_p3 = pnand %p5808_p9, %p5802_p2 }
  0x2c   : > { %5812 = shalt.err (!%p5809_p3)
}
  0x2d   : > { %s7099_s10 = sld [smem:[#allocation40_spill]]  ;;  %s47_s15 = sadd.s32 1, %s6155_s29 }
  0x2e   : > { %p48_p4 = scmp.ge.s32.totalorder %s47_s15, 2  ;;  %s5049_s30 = smul.u32 3, %s6303_s20 }
  0x2f   : > { %s5050_s13 = smul.u32 48, %s6155_s29  ;;  %s7101_s2 = sld [smem:[#allocation36_spill]] }
  0x30   : > { %s7135_s15 = smov (%p48_p4, %s47_s15), 0  ;;  %s485_s25 = scalar_lea.vmem [#allocation6], %s5049_s30 }
  0x31   : > { %7100 = sst [smem:[#allocation33_spill]] %s7135_s15  ;;  %s80_s28 = ssub.s32 %s6155_s29, %s7135_s15 }
  0x32   : > { %s493_s18 = sshll.u32 %s485_s25, 4  ;;  %p6338_p3 = scmp.eq.s32.totalorder %s80_s28, 0  ;;  %s494_s18 = int_to_ptr.vmem [resolvable:$true] %s493_s18 }
  0x33   : > { %5089 = dma.hbm_to_vmem [thread:$0]  (!%p6307_p11), %s7099_s10, 32, %s426_s19, [#allocation16]  }
  0x34   : > { %s7077_s19 = scalar_lea.sflag [#allocation7], %s6316_s23  ;;  %p6345_p10 = pneg %p6311_p12 }
  0x35   : > { %s491_s7 = scalar_lea.hbm %s7101_s2, %s5050_s13  ;;  %s5826_s14 = scalar_lea.vmem %s494_s18, 48 }
  0x36   : > { %p5827_p0 = scmp.ne.s32.totalorder %s494_s18, %s5826_s14  ;;  %s6162_s9 = smov [#allocation6]  }
  0x37   : > { %s5831_s13 = sshll.u32 %s6162_s9, 4  ;;  %s5832_s13 = int_to_ptr.vmem [resolvable:$false] %s5831_s13 }
  0x38   : > { %p5829_p1 = pnand %p5827_p0, %p6345_p10  ;;  %s5833_s28 = scalar_lea.vmem %s5832_s13, 96 }
  0x39   : > { %p5834_p5 = scmp.lt.s32.totalorder %s494_s18, %s5832_s13  ;;  %p5835_p7 = scmp.lt.s32.totalorder %s5833_s28, %s5826_s14 }
  0x3a   : > { %p5830_p2 = pneg %p5829_p1 }
  0x3b   : > { %p5836_p9 = por %p5835_p7, %p5834_p5 }
  0x3d   : > { %p5837_p4 = pnand %p5836_p9, %p5830_p2 }
  0x3f   : > { %5840 = shalt.err (!%p5837_p4)
}
  0x40   : > { %5102 = dma.hbm_to_vmem [thread:$0]  (!%p6311_p12), %s491_s7, 48, %s494_s18, %s7077_s19  }
  0x41   : > { %s7104_s30 = sadd.s32 1, %s6147_s27  ;;  %s4539_s14 = sshll.u32 %s6303_s20, 1 }
  0x42   : > { %s6360_s24 = scalar_select %p6338_p3, %s6147_s27, %s7104_s30  }
  0x43   : > { %s4998_s25 = sshll.u32 %s6155_s29, 5  ;;  %s7105_s4 = sld [smem:[#allocation37_spill]] }
  0x44   : > { %s525_s2 = scalar_lea.vmem [#allocation9], %s4539_s14  ;;  %s7081_s16 = scalar_lea.sflag [#allocation10], %s6316_s23 }
  0x45   : > { %s533_s15 = sshll.u32 %s525_s2, 4  ;;  %s6163_s7 = smov [#allocation9]   ;;  %s534_s15 = int_to_ptr.vmem [resolvable:$true] %s533_s15 }
  0x46   : > { %s5854_s26 = scalar_lea.vmem %s534_s15, 32  ;;  %s5859_s18 = sshll.u32 %s6163_s7, 4  ;;  %s5860_s18 = int_to_ptr.vmem [resolvable:$false] %s5859_s18 }
  0x47   : > { %p5855_p0 = scmp.ne.s32.totalorder %s534_s15, %s5854_s26  ;;  %s5861_s0 = scalar_lea.vmem %s5860_s18, 64 }
  0x48   : > { %p5862_p3 = scmp.lt.s32.totalorder %s534_s15, %s5860_s18  ;;  %p5863_p5 = scmp.lt.s32.totalorder %s5861_s0, %s5854_s26 }
  0x49   : > { %s531_s28 = scalar_lea.hbm %s7105_s4, %s4998_s25  ;;  %p5857_p1 = pnand %p5855_p0, %p6345_p10 }
  0x4a   : > { %p5864_p7 = por %p5863_p5, %p5862_p3 }
  0x4b   : > { %p5858_p2 = pneg %p5857_p1 }
  0x4d   : > { %p5865_p9 = pnand %p5864_p7, %p5858_p2 }
  0x4f   : > { %5868 = shalt.err (!%p5865_p9)
}
  0x50   : > { %5108 = dma.hbm_to_vmem [thread:$0]  (!%p6311_p12), %s531_s28, 32, %s534_s15, %s7081_s16  }
  0x51   : > { %s571_s9 = scalar_lea.hbm %s7059_s6, %s4998_s25  ;;  %s565_s13 = scalar_lea.vmem [#allocation12], %s4539_s14 }
  0x52   : > { %s573_s7 = sshll.u32 %s565_s13, 4  ;;  %s7080_s19 = scalar_lea.sflag [#allocation13], %s6316_s23  ;;  %s574_s7 = int_to_ptr.vmem [resolvable:$true] %s573_s7 }
  0x53   : > { %s5882_s18 = scalar_lea.vmem %s574_s7, 32  ;;  %s6164_s26 = smov [#allocation12]  }
  0x54   : > { %p5883_p4 = scmp.ne.s32.totalorder %s574_s7, %s5882_s18  ;;  %s5887_s0 = sshll.u32 %s6164_s26, 4  ;;  %s5888_s0 = int_to_ptr.vmem [resolvable:$false] %s5887_s0 }
  0x55   : > { %s5889_s4 = scalar_lea.vmem %s5888_s0, 64  ;;  %p5890_p2 = scmp.lt.s32.totalorder %s574_s7, %s5888_s0 }
  0x56   : > { %p5885_p0 = pnand %p5883_p4, %p6345_p10  ;;  %p5891_p3 = scmp.lt.s32.totalorder %s5889_s4, %s5882_s18 }
  0x58   : > { %p5886_p1 = pneg %p5885_p0  ;;  %p5892_p5 = por %p5891_p3, %p5890_p2 }
  0x5a   : > { %p5893_p7 = pnand %p5892_p5, %p5886_p1 }
  0x5c   : > { %5896 = shalt.err (!%p5893_p7)
}
  0x5d   : > { %5114 = dma.hbm_to_vmem [thread:$0]  (!%p6311_p12), %s571_s9, 32, %s574_s7, %s7080_s19  }
  0x5e   : > { %s6165_s15 = smov [#allocation17]  }
  0x5f   : > { %s435_s14 = sshll.u32 %s6165_s15, 4  ;;  %s436_s14 = int_to_ptr.vmem [resolvable:$true] %s435_s14 }
  0x60   : > { %s5908_s25 = scalar_lea.vmem %s436_s14, 2048  ;;  %p5916_p6 = scmp.lt.s32.totalorder %s436_s14, %s436_s14 }
  0x61   : > { %p5909_p9 = scmp.ne.s32.totalorder %s436_s14, %s5908_s25  ;;  %p5917_p8 = scmp.lt.s32.totalorder %s5908_s25, %s5908_s25 }
  0x63   : > { %p5911_p4 = pnand %p5909_p9, %p5789_p13  ;;  %p5918_p2 = por %p5917_p8, %p5916_p6 }
  0x65   : > { %p5912_p0 = pneg %p5911_p4 }
  0x67   : > { %p5919_p1 = pnand %p5918_p2, %p5912_p0 }
  0x69   : > { %5922 = shalt.err (!%p5919_p1)
}
  0x6a   : > { %s6166_s4 = smov 64   ;;  %s6167_s28 = smov 4  }
  0x6b   : > { %5092 = dma.hbm_to_vmem [thread:$0]  (!%p6307_p11), %s7064_s11, 2048, %s436_s14, [#allocation16], %s6166_s4, %s6166_s4, %s6167_s28  }
  0x6c   : > { %s6168_s9 = smov [#allocation18]   ;;  %s5047_s7 = smul.u32 2352, %s6303_s20 }
  0x6d   : > { %s449_s13 = sshll.u32 %s6168_s9, 4  ;;  %s5048_s18 = smul.u32 37632, %s6155_s29  ;;  %s450_s13 = int_to_ptr.vmem [resolvable:$true] %s449_s13 }
  0x6e   : > { %s5934_s26 = scalar_lea.vmem %s450_s13, 16  ;;  %s5941_s0 = scalar_lea.vmem %s450_s13, 32 }
  0x6f   : > { %p5935_p6 = scmp.ne.s32.totalorder %s450_s13, %s5934_s26  ;;  %p5942_p5 = scmp.lt.s32.totalorder %s450_s13, %s450_s13 }
  0x70   : > { %p5943_p7 = scmp.lt.s32.totalorder %s5941_s0, %s5934_s26 }
  0x71   : > { %p5937_p8 = pnand %p5935_p6, %p5789_p13 }
  0x72   : > { %p5944_p9 = por %p5943_p7, %p5942_p5 }
  0x73   : > { %p5938_p3 = pneg %p5937_p8 }
  0x75   : > { %p5945_p4 = pnand %p5944_p9, %p5938_p3 }
  0x77   : > { %5948 = shalt.err (!%p5945_p4)
}
  0x78   : > { %5095 = dma.hbm_to_vmem [thread:$0]  (!%p6307_p11), %s7065_s12, 16, %s450_s13, [#allocation19]  }
  0x79   : > { %s7106_s1 = sld [smem:[#allocation35_spill]]  ;;  %s464_s2 = scalar_lea.vmem [#allocation3], %s5047_s7 }
  0x7a   : > { %s471_s30 = sshll.u32 %s464_s2, 4  ;;  %s461_s9 = scalar_lea.sflag [#allocation4], %s6303_s20  ;;  %s472_s30 = int_to_ptr.vmem [resolvable:$true] %s471_s30 }
  0x7b   : > { %s5962_s26 = scalar_lea.vmem %s472_s30, 37632  ;;  %s6169_s21 = smov [#allocation3]  }
  0x7c   : > { %p5963_p13 = scmp.ne.s32.totalorder %s472_s30, %s5962_s26  ;;  %s5967_s0 = sshll.u32 %s6169_s21, 4  ;;  %s5968_s0 = int_to_ptr.vmem [resolvable:$false] %s5967_s0 }
  0x7d   : > { %s5969_s15 = scalar_lea.vmem %s5968_s0, 75264  ;;  %p5970_p1 = scmp.lt.s32.totalorder %s472_s30, %s5968_s0 }
  0x7e   : > { %p5965_p0 = pnand %p5963_p13, %p6345_p10  ;;  %p5971_p6 = scmp.lt.s32.totalorder %s5969_s15, %s5962_s26 }
  0x7f   : > { %s470_s28 = scalar_lea.hbm %s7106_s1, %s5048_s18 }
  0x80   : > { %p5966_p2 = pneg %p5965_p0  ;;  %p5972_p11 = por %p5971_p6, %p5970_p1 }
  0x82   : > { %p5973_p8 = pnand %p5972_p11, %p5966_p2 }
  0x84   : > { %5976 = shalt.err (!%p5973_p8)
}
  0x85   : > { %s6170_s13 = smov 768   ;;  %s6171_s7 = smov 48  }
  0x86   : > { %5099 = dma.hbm_to_vmem [thread:$0]  (!%p6311_p12), %s470_s28, 37632, %s472_s30, %s461_s9, %s6170_s13, %s6170_s13, %s6171_s7  }
  0x87   : > { %s5051_s18 = smul.u32 384, %s6303_s20  ;;  %s4542_s25 = sshll.u32 %s6303_s20, 8 }
  0x88   : > { %s5052_s14 = smul.u32 6144, %s6155_s29  ;;  %s6172_s19 = smov [#allocation8]  }
  0x89   : > { %s504_s26 = scalar_lea.vmem [#allocation8], %s5051_s18  ;;  %s5995_s16 = sshll.u32 %s6172_s19, 4  ;;  %s5996_s16 = int_to_ptr.vmem [resolvable:$false] %s5995_s16 }
  0x8a   : > { %s510_s21 = scalar_lea.hbm %s7056_s3, %s5052_s14  ;;  %s511_s0 = sshll.u32 %s504_s26, 4  ;;  %s512_s0 = int_to_ptr.vmem [resolvable:$true] %s511_s0 }
  0x8b   : > { %s5990_s15 = scalar_lea.vmem %s512_s0, 6144  ;;  %s5997_s1 = scalar_lea.vmem %s5996_s16, 12288 }
  0x8c   : > { %p5991_p3 = scmp.ne.s32.totalorder %s512_s0, %s5990_s15  ;;  %p5998_p9 = scmp.lt.s32.totalorder %s512_s0, %s5996_s16 }
  0x8d   : > { %p5999_p4 = scmp.lt.s32.totalorder %s5997_s1, %s5990_s15 }
  0x8e   : > { %p5993_p5 = pnand %p5991_p3, %p6345_p10 }
  0x8f   : > { %p6000_p13 = por %p5999_p4, %p5998_p9 }
  0x90   : > { %p5994_p7 = pneg %p5993_p5 }
  0x92   : > { %p6001_p0 = pnand %p6000_p13, %p5994_p7 }
  0x94   : > { %6004 = shalt.err (!%p6001_p0)
}
  0x95   : > { %s6173_s28 = smov 128   ;;  %s6174_s30 = smov 8  }
  0x96   : > { %s7107_s9 = scalar_lea.sflag [#allocation7], %s6316_s23  ;;  %s4999_s13 = sshll.u32 %s6155_s29, 12 }
  0x97   : > { %5105 = dma.hbm_to_vmem [thread:$0]  (!%p6311_p12), %s510_s21, 6144, %s512_s0, %s7107_s9, %s6173_s28, %s6173_s28, %s6174_s30  }
  0x98   : > { %s544_s7 = scalar_lea.vmem [#allocation11], %s4542_s25  ;;  %s550_s16 = scalar_lea.hbm %s7058_s5, %s4999_s13 }
  0x99   : > { %s551_s18 = sshll.u32 %s544_s7, 4  ;;  %s6175_s4 = smov [#allocation11]   ;;  %s552_s18 = int_to_ptr.vmem [resolvable:$true] %s551_s18 }
  0x9a   : > { %s6018_s1 = scalar_lea.vmem %s552_s18, 4096  ;;  %s6023_s2 = sshll.u32 %s6175_s4, 4  ;;  %s6024_s2 = int_to_ptr.vmem [resolvable:$false] %s6023_s2 }
  0x9b   : > { %p6019_p2 = scmp.ne.s32.totalorder %s552_s18, %s6018_s1  ;;  %s6025_s26 = scalar_lea.vmem %s6024_s2, 8192 }
  0x9c   : > { %p6026_p11 = scmp.lt.s32.totalorder %s552_s18, %s6024_s2  ;;  %p6027_p8 = scmp.lt.s32.totalorder %s6025_s26, %s6018_s1 }
  0x9d   : > { %p6021_p1 = pnand %p6019_p2, %p6345_p10 }
  0x9e   : > { %p6028_p3 = por %p6027_p8, %p6026_p11 }
  0x9f   : > { %p6022_p6 = pneg %p6021_p1 }
  0xa1   : > { %p6029_p5 = pnand %p6028_p3, %p6022_p6 }
  0xa3   : > { %6032 = shalt.err (!%p6029_p5)
}
  0xa4   : > { %s7108_s25 = scalar_lea.sflag [#allocation10], %s6316_s23  ;;  %s4548_s21 = sshll.u32 %s6155_s29, 4 }
  0xa5   : > { %5111 = dma.hbm_to_vmem [thread:$0]  (!%p6311_p12), %s550_s16, 4096, %s552_s18, %s7108_s25, %s6173_s28, %s6173_s28, %s6174_s30  }
  0xa6   : > { %s596_s9 = scalar_lea.hbm %s7061_s8, %s4548_s21  ;;  %s591_s13 = scalar_lea.vmem [#allocation14], %s6303_s20 }
  0xa7   : > { %s598_s7 = sshll.u32 %s591_s13, 4  ;;  %s6176_s14 = smov [#allocation14]   ;;  %s599_s7 = int_to_ptr.vmem [resolvable:$true] %s598_s7 }
  0xa8   : > { %s6046_s19 = scalar_lea.vmem %s599_s7, 16  ;;  %s6051_s1 = sshll.u32 %s6176_s14, 4  ;;  %s6052_s1 = int_to_ptr.vmem [resolvable:$false] %s6051_s1 }
  0xa9   : > { %p6047_p7 = scmp.ne.s32.totalorder %s599_s7, %s6046_s19  ;;  %s6053_s4 = scalar_lea.vmem %s6052_s1, 32 }
  0xaa   : > { %p6054_p13 = scmp.lt.s32.totalorder %s599_s7, %s6052_s1  ;;  %p6055_p0 = scmp.lt.s32.totalorder %s6053_s4, %s6046_s19 }
  0xab   : > { %p6049_p9 = pnand %p6047_p7, %p6345_p10 }
  0xac   : > { %p6056_p2 = por %p6055_p0, %p6054_p13 }
  0xad   : > { %p6050_p4 = pneg %p6049_p9 }
  0xaf   : > { %p6057_p1 = pnand %p6056_p2, %p6050_p4 }
  0xb1   : > { %6060 = shalt.err (!%p6057_p1)
}
  0xb2   : > { %s7109_s20 = scalar_lea.sflag [#allocation13], %s6316_s23  ;;  %p7110_p6 = scmp.ne.s32.totalorder %s7096_s17, 0 }
  0xb3   : > { %5117 = dma.hbm_to_vmem [thread:$0]  (!%p6311_p12), %s596_s9, 16, %s599_s7, %s7109_s20  }
  0xb4   : > { %615 = sbr.rel (%p7110_p6) target bundleno = 1821 (0x71d), region = 72  ;;  %s7111_s10 = sld [smem:[#allocation28_spill]] (!%p7110_p6) }
  0xb5   : > { %s7112_s28 = sld [smem:[#allocation32_spill]] (!%p7110_p6) }
  0xba   : > { %s6446_s30 = sand.u32 1, %s7111_s10  }
  0xbb   : > { %s5053_s18 = smul.u32 2352, %s6446_s30  ;;  %s618_s16 = scalar_lea.sflag [#allocation4], %s6446_s30 }
  0xbc   : > { %p7113_p10 = scmp.ne.s32.totalorder %s7112_s28, 0 }
  0xbd   : > { %s6450_s2 = scalar_lea.vmem [#allocation3], %s5053_s18 }
  0xbe   : > { %6110 = dma.done.wait (%p7113_p10), %s618_s16, 37632  }
  0xbf   : > { %6112 = vsyncadd (%p7113_p10), %s618_s16, 4294929664  ;;  %s7114_s22 = sld [smem:[#allocation31_spill]]  ;;  %s5054_s23 = smul.u32 3, %s6446_s30 }
  0xc1   : > { %s6458_s25 = scalar_lea.vmem [#allocation6], %s5054_s23 }
  0xc5   : > { %s626_s17 = sand.u32 1, %s7114_s22  }
  0xc6   : > { %s627_s26 = scalar_lea.sflag [#allocation7], %s626_s17 }
  0xc7   : > { %6114 = dma.done.wait (%p7113_p10), %s627_s26, 6192  }
  0xc8   : > { %6116 = vsyncadd (%p7113_p10), %s627_s26, 4294961104  ;;  %s5055_s21 = smul.u32 384, %s6446_s30  ;;  %s4550_s0 = sshll.u32 %s6446_s30, 1 }
  0xc9   : > { %s645_s9 = scalar_lea.sflag [#allocation10], %s626_s17  ;;  %s6468_s13 = scalar_lea.vmem [#allocation9], %s4550_s0 }
  0xca   : > { %s6466_s15 = scalar_lea.vmem [#allocation8], %s5055_s21 }
  0xcb   : > { %6118 = dma.done.wait (%p7113_p10), %s645_s9, 4128  }
  0xcc   : > { %6120 = vsyncadd (%p7113_p10), %s645_s9, 4294963168  ;;  %s4551_s7 = sshll.u32 %s6446_s30, 8  ;;  %s663_s14 = scalar_lea.sflag [#allocation13], %s626_s17 }
  0xcd   : > { %s6475_s19 = scalar_lea.vmem [#allocation11], %s4551_s7  ;;  %s6477_s1 = scalar_lea.vmem [#allocation12], %s4550_s0 }
  0xce   : > { %6122 = dma.done.wait (%p7113_p10), %s663_s14, 48  }
  0xcf   : > { %6124 = vsyncadd (%p7113_p10), %s663_s14, 4294967248  ;;  %s674_s4 = scalar_lea.vmem [#allocation14], %s6446_s30  ;;  %p7115_p12 = scmp.eq.s32.totalorder %s7114_s22, 0 }
  0xd1   : > { %6126 = dma.done.wait (%p7115_p12), [#allocation16], 2080   ;;  %p7116_p11 = pmov %p7115_p12 }
  0xd3   : > { %6128 = vsyncadd (%p7116_p11), [#allocation16], 4294965216  ;;  %p7117_p8 = pmov %p7116_p11 }
  0xd5   : > { %6130 = dma.done.wait (%p7117_p8), [#allocation19], 16   ;;  %p7118_p3 = pmov %p7117_p8 }
  0xd6   : > { %v5187_v0 = vld [vmem:[%s6450_s2 + $0x2a4] ss:$48 sps:$4 sm:$0xff]   ;;  %v5191_v2 = vld [vmem:[%s6450_s2 + $0x2a0] ss:$48 sps:$4 sm:$0xff]   ;;  %v6177_v18 = vmov 1983009808   ;;  %v790_v20 = vlaneseq }
  0xd7   : > { %6132 = vsyncadd (%p7118_p3), [#allocation19], 4294967280  ;;  %v5189_v1 = vld [vmem:[%s6450_s2 + $0x8a4] ss:$48 sps:$4 sm:$0xff]   ;;  %2616 = vmatprep.subr.bf16.mxu0 %v5187_v0  ;;  %v5192_v3 = vld [vmem:[%s6450_s2 + $0x8a0] ss:$48 sps:$4 sm:$0xff]   ;;  %v788_v19 = vunpack.c.l.s4 %v6177_v18 }
  0xd8   : > { %2657 = vmatprep.subr.bf16.mxu1 %v5189_v1  ;;  %v5193_v4 = vld [vmem:[%s6450_s2 + $0x244] ss:$48 sps:$4 sm:$0xff]   ;;  %2617 = vmatpush1.bf16.msra.mxu0 %v5191_v2  ;;  %v5197_v6 = vld [vmem:[%s6450_s2 + $0x240] ss:$48 sps:$4 sm:$0xff]   ;;  %v6514_v26 = vshrl.u32 %v790_v20, 7  ;;  %s7119_s28 = sld [smem:[#allocation34_spill]] }
  0xd9   : > { %2658 = vmatpush1.bf16.msra.mxu1 %v5192_v3  ;;  %v5195_v5 = vld [vmem:[%s6450_s2 + $0x844] ss:$48 sps:$4 sm:$0xff]   ;;  %2618 = vmatprep.subr.bf16.mxu0 %v5193_v4  ;;  %v5198_v7 = vld [vmem:[%s6450_s2 + $0x840] ss:$48 sps:$4 sm:$0xff]   ;;  %v789_v25 = vunpack.c.0.s8 %v788_v19  ;;  %vm2579_vm0 = vcmask 1043456   ;;  %vm2575_vm1 = vcmask 64512  }
  0xda   : > { %2659 = vmatprep.subr.bf16.mxu1 %v5195_v5  ;;  %v5199_v8 = vld [vmem:[%s6450_s2 + $0x1e4] ss:$48 sps:$4 sm:$0xff]   ;;  %v5203_v10 = vld [vmem:[%s6450_s2 + $0x1e0] ss:$48 sps:$4 sm:$0xff]   ;;  %v5245_v53 = vld [vmem:[%s6450_s2 + $0x2ac] ss:$48 sps:$4 sm:$0xff]  }
  0xdb   : > { %v5201_v9 = vld [vmem:[%s6450_s2 + $0x7e4] ss:$48 sps:$4 sm:$0xff]   ;;  %v5204_v11 = vld [vmem:[%s6450_s2 + $0x7e0] ss:$48 sps:$4 sm:$0xff]   ;;  %v6522_v32 = vsub.s32 %v789_v25, %v6514_v26  ;;  %v5243_v55 = vld [vmem:[%s6450_s2 + $0x2a8] ss:$48 sps:$4 sm:$0xff]  }
  0xdc   : > { %2619 = vmatpush1.bf16.msra.mxu0 %v5197_v6  ;;  %v5205_v12 = vld [vmem:[%s6450_s2 + $0x184] ss:$48 sps:$4 sm:$0xff]   ;;  %v5209_v14 = vld [vmem:[%s6450_s2 + $0x180] ss:$48 sps:$4 sm:$0xff]   ;;  %v5251_v58 = vld [vmem:[%s6450_s2 + $0x24c] ss:$48 sps:$4 sm:$0xff]  }
  0xdd   : > { %2660 = vmatpush1.bf16.msra.mxu1 %v5198_v7  ;;  %2620 = vmatprep.subr.bf16.mxu0 %v5199_v8  ;;  %v5207_v13 = vld [vmem:[%s6450_s2 + $0x784] ss:$48 sps:$4 sm:$0xff]   ;;  %v5210_v15 = vld [vmem:[%s6450_s2 + $0x780] ss:$48 sps:$4 sm:$0xff]   ;;  %v5249_v59 = vld [vmem:[%s6450_s2 + $0x248] ss:$48 sps:$4 sm:$0xff]  }
  0xde   : > { %2661 = vmatprep.subr.bf16.mxu1 %v5201_v9  ;;  %v5211_v16 = vld [vmem:[%s6450_s2 + $0x124] ss:$48 sps:$4 sm:$0xff]   ;;  %v5215_v21 = vld [vmem:[%s6450_s2 + $0x120] ss:$48 sps:$4 sm:$0xff]   ;;  %v5257_v62 = vld [vmem:[%s6450_s2 + $0x1ec] ss:$48 sps:$4 sm:$0xff]  }
  0xdf   : > { %v5213_v17 = vld [vmem:[%s6450_s2 + $0x724] ss:$48 sps:$4 sm:$0xff]   ;;  %v5216_v22 = vld [vmem:[%s6450_s2 + $0x720] ss:$48 sps:$4 sm:$0xff]   ;;  %v5255_v63 = vld [vmem:[%s6450_s2 + $0x1e8] ss:$48 sps:$4 sm:$0xff]  }
  0xe0   : > { %2621 = vmatpush1.bf16.msra.mxu0 %v5203_v10  ;;  %v5217_v23 = vld [vmem:[%s6450_s2 + $0xc4] ss:$48 sps:$4 sm:$0xff]   ;;  %v5221_v27 = vld [vmem:[%s6450_s2 + $0xc0] ss:$48 sps:$4 sm:$0xff]   ;;  %v5263_v2 = vld [vmem:[%s6450_s2 + $0x18c] ss:$48 sps:$4 sm:$0xff]  }
  0xe1   : > { %2662 = vmatpush1.bf16.msra.mxu1 %v5204_v11  ;;  %2622 = vmatprep.subr.bf16.mxu0 %v5205_v12  ;;  %v5219_v24 = vld [vmem:[%s6450_s2 + $0x6c4] ss:$48 sps:$4 sm:$0xff]   ;;  %v5222_v28 = vld [vmem:[%s6450_s2 + $0x6c0] ss:$48 sps:$4 sm:$0xff]   ;;  %v5261_v3 = vld [vmem:[%s6450_s2 + $0x188] ss:$48 sps:$4 sm:$0xff]  }
  0xe2   : > { %2663 = vmatprep.subr.bf16.mxu1 %v5207_v13  ;;  %v5223_v29 = vld [vmem:[%s6450_s2 + $0x64] ss:$48 sps:$4 sm:$0xff]   ;;  %v5227_v31 = vld [vmem:[%s6450_s2 + $0x60] ss:$48 sps:$4 sm:$0xff]   ;;  %v5269_v6 = vld [vmem:[%s6450_s2 + $0x12c] ss:$48 sps:$4 sm:$0xff]  }
  0xe3   : > { %v5225_v30 = vld [vmem:[%s6450_s2 + $0x664] ss:$48 sps:$4 sm:$0xff]   ;;  %v784_v33 = vld [vmem:[%s7119_s28] sm:$0xff]  ;;  %v5267_v7 = vld [vmem:[%s6450_s2 + $0x128] ss:$48 sps:$4 sm:$0xff]   ;;  %s7120_s18 = sld [smem:[#allocation29_spill]] }
  0xe4   : > { %2623 = vmatpush1.bf16.msra.mxu0 %v5209_v14  ;;  %v5228_v34 = vld [vmem:[%s6450_s2 + $0x660] ss:$48 sps:$4 sm:$0xff]   ;;  %v786_v35 = vcombine.high %v784_v33, %v784_v33  ;;  %v6529_v36 = vrot.slane %v784_v33, %v6522_v32  ;;  %v5229_v37 = vld [vmem:[%s6450_s2 + $0x4] ss:$48 sps:$4 sm:$0xff]   ;;  %v5275_v10 = vld [vmem:[%s6450_s2 + $0xcc] ss:$48 sps:$4 sm:$0xff]  }
  0xe5   : > { %2664 = vmatpush1.bf16.msra.mxu1 %v5210_v15  ;;  %2624 = vmatprep.subr.bf16.mxu0 %v5211_v16  ;;  %v5231_v38 = vld [vmem:[%s6450_s2 + $0x604] ss:$48 sps:$4 sm:$0xff]   ;;  %v5233_v42 = vld [vmem:[%s6450_s2] ss:$48 sps:$4 sm:$0xff]   ;;  %v5273_v11 = vld [vmem:[%s6450_s2 + $0xc8] ss:$48 sps:$4 sm:$0xff]  }
  0xe6   : > { %2665 = vmatprep.subr.bf16.mxu1 %v5213_v17  ;;  %v1099_v39 = vld [vmem:[%s6450_s2 + $0x900] sm:$0xff]  ;;  %v800_v40 = vrot.slane %v786_v35, %v6522_v32  ;;  %v801_v41 = vcombine.high %v6529_v36, %v6529_v36  ;;  %v5281_v14 = vld [vmem:[%s6450_s2 + $0x6c] ss:$48 sps:$4 sm:$0xff]   ;;  %v5279_v15 = vld [vmem:[%s6450_s2 + $0x68] ss:$48 sps:$4 sm:$0xff]   ;;  %v6586_v19 = vpack.c.bf16 %v6529_v36, %v6529_v36  ;;  %s7121_s23 = sld [smem:[#allocation38_spill]] }
  0xe7   : > { %v5234_v43 = vld [vmem:[%s6450_s2 + $0x600] ss:$48 sps:$4 sm:$0xff]   ;;  %v5235_v46 = vld [vmem:[%s6450_s2 + $0x5a4] ss:$48 sps:$4 sm:$0xff]   ;;  %v4849_v47 = vcombine.high %v1099_v39, %v1099_v39  ;;  %v4848_v48 = vcombine.low %v1099_v39, %v1099_v39  ;;  %v5285_v17 = vld [vmem:[%s6450_s2 + $0xc] ss:$48 sps:$4 sm:$0xff]  }
  0xe8   : > { %2625 = vmatpush1.bf16.msra.mxu0 %v5215_v21  ;;  %v802_v44 = vcombine.high %v800_v40, %v800_v40  ;;  %v6539_v45 = vpack.c.bf16 %v801_v41, %v801_v41  ;;  %v5238_v50 = vld [vmem:[%s6450_s2 + $0x5a0] ss:$48 sps:$4 sm:$0xff]   ;;  %v5241_v52 = vld [vmem:[%s6450_s2 + $0x544] ss:$48 sps:$4 sm:$0xff]   ;;  %v6552_v54 = vpack.c.bf16 %v800_v40, %v800_v40  ;;  %v5288_v18 = vld [vmem:[%s6450_s2 + $0x8ac] ss:$48 sps:$4 sm:$0xff]  }
  0xe9   : > { %2666 = vmatpush1.bf16.msra.mxu1 %v5216_v22  ;;  %2626 = vmatprep.subr.bf16.mxu0 %v5217_v23  ;;  %v2581_v51 = vsel %vm2579_vm0, %v4848_v48, 0  ;;  %v5246_v56 = vld [vmem:[%s6450_s2 + $0x540] ss:$48 sps:$4 sm:$0xff]   ;;  %v5247_v57 = vld [vmem:[%s6450_s2 + $0x4e4] ss:$48 sps:$4 sm:$0xff]   ;;  %p773_p5 = scmp.lt.s32.totalorder %s7120_s18, 1 }
  0xea   : > { %2667 = vmatprep.subr.bf16.mxu1 %v5219_v24  ;;  %v6542_v49 = vpack.c.bf16 %v802_v44, %v802_v44  ;;  %2648 = vmatprep.mubr.bf16.mxu0 %v6539_v45  ;;  %v5252_v60 = vld [vmem:[%s6450_s2 + $0x4e0] ss:$48 sps:$4 sm:$0xff]   ;;  %v5253_v61 = vld [vmem:[%s6450_s2 + $0x484] ss:$48 sps:$4 sm:$0xff]   ;;  %v5283_v20 = vld [vmem:[%s6450_s2 + $0x8] ss:$48 sps:$4 sm:$0xff]  }
  0xeb   : > { %v5258_v0 = vld [vmem:[%s6450_s2 + $0x480] ss:$48 sps:$4 sm:$0xff]   ;;  %v5259_v1 = vld [vmem:[%s6450_s2 + $0x424] ss:$48 sps:$4 sm:$0xff]   ;;  %v5286_v21 = vld [vmem:[%s6450_s2 + $0x8a8] ss:$48 sps:$4 sm:$0xff]  }
  0xec   : > { %2627 = vmatpush1.bf16.msra.mxu0 %v5221_v27  ;;  %4861 = vmatprep.mubr.msk.bf16.mxu1 %vm2575_vm1, %v6542_v49  ;;  %v5264_v4 = vld [vmem:[%s6450_s2 + $0x420] ss:$48 sps:$4 sm:$0xff]   ;;  %v5265_v5 = vld [vmem:[%s6450_s2 + $0x3c4] ss:$48 sps:$4 sm:$0xff]   ;;  %v5291_v22 = vld [vmem:[%s6450_s2 + $0x5ac] ss:$48 sps:$4 sm:$0xff]  }
  0xed   : > { %2668 = vmatpush1.bf16.msra.mxu1 %v5222_v28  ;;  %2628 = vmatprep.subr.bf16.mxu0 %v5223_v29  ;;  %v5270_v8 = vld [vmem:[%s6450_s2 + $0x3c0] ss:$48 sps:$4 sm:$0xff]   ;;  %v5271_v9 = vld [vmem:[%s6450_s2 + $0x364] ss:$48 sps:$4 sm:$0xff]   ;;  %v5294_v23 = vld [vmem:[%s6450_s2 + $0x84c] ss:$48 sps:$4 sm:$0xff]  }
  0xee   : > { %2669 = vmatprep.subr.bf16.mxu1 %v5225_v30  ;;  %v5276_v12 = vld [vmem:[%s6450_s2 + $0x360] ss:$48 sps:$4 sm:$0xff]   ;;  %v5277_v13 = vld [vmem:[%s6450_s2 + $0x304] ss:$48 sps:$4 sm:$0xff]   ;;  %v5289_v24 = vld [vmem:[%s6450_s2 + $0x5a8] ss:$48 sps:$4 sm:$0xff]  }
  0xef   : > { %v5282_v16 = vld [vmem:[%s6450_s2 + $0x300] ss:$48 sps:$4 sm:$0xff]   ;;  %v5292_v25 = vld [vmem:[%s6450_s2 + $0x848] ss:$48 sps:$4 sm:$0xff]   ;;  %v5297_v27 = vld [vmem:[%s6450_s2 + $0x54c] ss:$48 sps:$4 sm:$0xff]  }
  0xf0   : > { %2629 = vmatpush1.bf16.msra.mxu0 %v5227_v31  ;;  %v5300_v28 = vld [vmem:[%s6450_s2 + $0x7ec] ss:$48 sps:$4 sm:$0xff]   ;;  %v5295_v29 = vld [vmem:[%s6450_s2 + $0x548] ss:$48 sps:$4 sm:$0xff]   ;;  %s6978_s16 = scalar_select %p773_p5, %s7120_s18, 1  ;;  %vm3968_vm2 = vcmask 1044480  }
  0xf1   : > { %2670 = vmatpush1.bf16.msra.mxu1 %v5228_v34  ;;  %2630 = vmatprep.subr.bf16.mxu0 %v5229_v37  ;;  %v5298_v30 = vld [vmem:[%s6450_s2 + $0x7e8] ss:$48 sps:$4 sm:$0xff]   ;;  %v5303_v31 = vld [vmem:[%s6450_s2 + $0x4ec] ss:$48 sps:$4 sm:$0xff]   ;;  %vm3964_vm3 = vcmask 80896   ;;  %p4973_p7 = scmp.ne.s32.totalorder %s7120_s18, 0 }
  0xf2   : > { %2671 = vmatprep.subr.bf16.mxu1 %v5231_v38  ;;  %v5306_v33 = vld [vmem:[%s6450_s2 + $0x78c] ss:$48 sps:$4 sm:$0xff]   ;;  %v5301_v34 = vld [vmem:[%s6450_s2 + $0x4e8] ss:$48 sps:$4 sm:$0xff]  }
  0xf3   : > { %v5304_v35 = vld [vmem:[%s6450_s2 + $0x788] ss:$48 sps:$4 sm:$0xff]   ;;  %v5309_v36 = vld [vmem:[%s6450_s2 + $0x48c] ss:$48 sps:$4 sm:$0xff]  }
  0xf4   : > { %2631 = vmatpush1.bf16.msra.mxu0 %v5233_v42  ;;  %v5312_v37 = vld [vmem:[%s6450_s2 + $0x72c] ss:$48 sps:$4 sm:$0xff]   ;;  %v5307_v38 = vld [vmem:[%s6450_s2 + $0x488] ss:$48 sps:$4 sm:$0xff]  }
  0xf5   : > { %2672 = vmatpush1.bf16.msra.mxu1 %v5234_v43  ;;  %2632 = vmatprep.subr.bf16.mxu0 %v5235_v46  ;;  %v5310_v39 = vld [vmem:[%s6450_s2 + $0x728] ss:$48 sps:$4 sm:$0xff]   ;;  %v5315_v40 = vld [vmem:[%s6450_s2 + $0x42c] ss:$48 sps:$4 sm:$0xff]  }
  0xf6   : > { %4860 = vmatprep.subr.msk.bf16.mxu1 %vm2579_vm0, %v4849_v47  ;;  %v5318_v41 = vld [vmem:[%s6450_s2 + $0x6cc] ss:$48 sps:$4 sm:$0xff]   ;;  %v5313_v42 = vld [vmem:[%s6450_s2 + $0x428] ss:$48 sps:$4 sm:$0xff]  }
  0xf7   : > { %v5316_v43 = vld [vmem:[%s6450_s2 + $0x6c8] ss:$48 sps:$4 sm:$0xff]   ;;  %v5321_v44 = vld [vmem:[%s6450_s2 + $0x3cc] ss:$48 sps:$4 sm:$0xff]  }
  0xf8   : > { %2633 = vmatpush2.bf16.msra.mxu0 %v5238_v50  ;;  %v5324_v46 = vld [vmem:[%s6450_s2 + $0x66c] ss:$48 sps:$4 sm:$0xff]   ;;  %v5319_v47 = vld [vmem:[%s6450_s2 + $0x3c8] ss:$48 sps:$4 sm:$0xff]  }
  0xf9   : > { %2688 = vmatpush2.bf16.msra.mxu1 %v2581_v51  ;;  %2634 = vmatprep.subr.bf16.mxu0 %v5241_v52  ;;  %v5322_v48 = vld [vmem:[%s6450_s2 + $0x668] ss:$48 sps:$4 sm:$0xff]   ;;  %v5327_v50 = vld [vmem:[%s6450_s2 + $0x36c] ss:$48 sps:$4 sm:$0xff]  }
  0xfa   : > { %2698 = vmatprep.subr.bf16.mxu1 %v5245_v53  ;;  %v5330_v51 = vld [vmem:[%s6450_s2 + $0x60c] ss:$48 sps:$4 sm:$0xff]   ;;  %v5325_v53 = vld [vmem:[%s6450_s2 + $0x368] ss:$48 sps:$4 sm:$0xff]  }
  0xfb   : > { %v1100_v52 = vld [vmem:[%s6450_s2 + $0x908] sm:$0xff] }
  0xfc   : > { %2690 = vmatmul.mubr.bf16.vlgmr.msra.gmra.mxu1 %v6552_v54  ;;  %2635 = vmatpush2.bf16.msra.mxu0 %v5246_v56  ;;  %v5333_v56 = vld [vmem:[%s6450_s2 + $0x30c] ss:$48 sps:$4 sm:$0xff]  }
  0xfd   : > { %2699 = vmatpush1.bf16.msra.mxu1 %v5243_v55  ;;  %2636 = vmatprep.subr.bf16.mxu0 %v5247_v57  ;;  %v5328_v55 = vld [vmem:[%s6450_s2 + $0x608] ss:$48 sps:$4 sm:$0xff]   ;;  %v4851_v57 = vcombine.high %v1100_v52, %v1100_v52 }
  0xfe   : > { %2700 = vmatprep.subr.bf16.mxu1 %v5251_v58  ;;  %2730 = vmatprep.mubr.bf16.mxu1 %v6539_v45  ;;  %v4850_v58 = vcombine.low %v1100_v52, %v1100_v52  ;;  %v5409_v52 = vld [vmem:[%s6450_s2 + $0x434] ss:$48 sps:$4 sm:$0xff]  }
 0x100   : > { %2637 = vmatpush2.bf16.msra.mxu0 %v5252_v60  ;;  %v5338_v60 = vld [vmem:[%s6450_s2 + $0x2b4] ss:$48 sps:$4 sm:$0xff]  }
 0x101   : > { %2701 = vmatpush1.bf16.msra.mxu1 %v5249_v59  ;;  %2638 = vmatprep.subr.bf16.mxu0 %v5253_v61  ;;  %v5331_v59 = vld [vmem:[%s6450_s2 + $0x308] ss:$48 sps:$4 sm:$0xff]   ;;  %v2587_v61 = vsel %vm2579_vm0, %v4850_v58, 0  ;;  %v5418_v58 = vld [vmem:[%s6450_s2 + $0x13c] ss:$48 sps:$4 sm:$0xff]  }
 0x102   : > { %2702 = vmatprep.subr.bf16.mxu1 %v5257_v62  ;;  %v5341_v62 = vld [vmem:[%s6450_s2 + $0x8b4] ss:$48 sps:$4 sm:$0xff]  }
 0x104   : > { %2639 = vmatpush2.bf16.msra.mxu0 %v5258_v0  ;;  %v5339_v0 = vld [vmem:[%s6450_s2 + $0x8b0] ss:$48 sps:$4 sm:$0xff]  }
 0x105   : > { %2703 = vmatpush1.bf16.msra.mxu1 %v5255_v63  ;;  %2640 = vmatprep.subr.bf16.mxu0 %v5259_v1  ;;  %v5336_v63 = vld [vmem:[%s6450_s2 + $0x2b0] ss:$48 sps:$4 sm:$0xff]   ;;  %v5344_v1 = vld [vmem:[%s6450_s2 + $0x254] ss:$48 sps:$4 sm:$0xff]  }
 0x106   : > { %2704 = vmatprep.subr.bf16.mxu1 %v5263_v2  ;;  %v5347_v2 = vld [vmem:[%s6450_s2 + $0x854] ss:$48 sps:$4 sm:$0xff]  }
 0x108   : > { %2641 = vmatpush2.bf16.msra.mxu0 %v5264_v4  ;;  %v5345_v4 = vld [vmem:[%s6450_s2 + $0x850] ss:$48 sps:$4 sm:$0xff]  }
 0x109   : > { %2705 = vmatpush1.bf16.msra.mxu1 %v5261_v3  ;;  %2642 = vmatprep.subr.bf16.mxu0 %v5265_v5  ;;  %v5342_v3 = vld [vmem:[%s6450_s2 + $0x250] ss:$48 sps:$4 sm:$0xff]   ;;  %v5350_v5 = vld [vmem:[%s6450_s2 + $0x1f4] ss:$48 sps:$4 sm:$0xff]  }
 0x10a   : > { %2706 = vmatprep.subr.bf16.mxu1 %v5269_v6  ;;  %v5353_v6 = vld [vmem:[%s6450_s2 + $0x7f4] ss:$48 sps:$4 sm:$0xff]  }
 0x10c   : > { %2643 = vmatpush2.bf16.msra.mxu0 %v5270_v8  ;;  %v5351_v8 = vld [vmem:[%s6450_s2 + $0x7f0] ss:$48 sps:$4 sm:$0xff]  }
 0x10d   : > { %2707 = vmatpush1.bf16.msra.mxu1 %v5267_v7  ;;  %2644 = vmatprep.subr.bf16.mxu0 %v5271_v9  ;;  %v5348_v7 = vld [vmem:[%s6450_s2 + $0x1f0] ss:$48 sps:$4 sm:$0xff]   ;;  %v5356_v9 = vld [vmem:[%s6450_s2 + $0x194] ss:$48 sps:$4 sm:$0xff]  }
 0x10e   : > { %2708 = vmatprep.subr.bf16.mxu1 %v5275_v10  ;;  %v5359_v10 = vld [vmem:[%s6450_s2 + $0x794] ss:$48 sps:$4 sm:$0xff]  }
 0x110   : > { %2645 = vmatpush2.bf16.msra.mxu0 %v5276_v12  ;;  %v5357_v12 = vld [vmem:[%s6450_s2 + $0x790] ss:$48 sps:$4 sm:$0xff]  }
 0x111   : > { %2709 = vmatpush1.bf16.msra.mxu1 %v5273_v11  ;;  %2646 = vmatprep.subr.bf16.mxu0 %v5277_v13  ;;  %v5354_v11 = vld [vmem:[%s6450_s2 + $0x190] ss:$48 sps:$4 sm:$0xff]   ;;  %v5362_v13 = vld [vmem:[%s6450_s2 + $0x134] ss:$48 sps:$4 sm:$0xff]  }
 0x112   : > { %2710 = vmatprep.subr.bf16.mxu1 %v5281_v14  ;;  %v5365_v14 = vld [vmem:[%s6450_s2 + $0x734] ss:$48 sps:$4 sm:$0xff]  }
 0x114   : > { %2647 = vmatpush2.bf16.msra.mxu0 %v5282_v16  ;;  %v5363_v16 = vld [vmem:[%s6450_s2 + $0x730] ss:$48 sps:$4 sm:$0xff]  }
 0x115   : > { %2711 = vmatpush1.bf16.msra.mxu1 %v5279_v15  ;;  %2739 = vmatprep.subr.bf16.mxu0 %v5288_v18  ;;  %v5360_v15 = vld [vmem:[%s6450_s2 + $0x130] ss:$48 sps:$4 sm:$0xff]   ;;  %v5371_v18 = vld [vmem:[%s6450_s2 + $0x6d4] ss:$48 sps:$4 sm:$0xff]  }
 0x116   : > { %2712 = vmatprep.subr.bf16.mxu1 %v5285_v17  ;;  %v5368_v17 = vld [vmem:[%s6450_s2 + $0xd4] ss:$48 sps:$4 sm:$0xff]  }
 0x117   : > { %2649 = vmatmul.mubr.bf16.vlgmr.msra.gmra.mxu0 %v6586_v19 }
 0x118   : > { %2740 = vmatpush1.bf16.msra.mxu0 %v5286_v21  ;;  %4863 = vmatprep.mubr.msk.bf16.mxu0 %vm2575_vm1, %v6542_v49  ;;  %v5369_v21 = vld [vmem:[%s6450_s2 + $0x6d0] ss:$48 sps:$4 sm:$0xff]  }
 0x119   : > { %2713 = vmatpush1.bf16.msra.mxu1 %v5283_v20  ;;  %2741 = vmatprep.subr.bf16.mxu0 %v5294_v23  ;;  %v5366_v20 = vld [vmem:[%s6450_s2 + $0xd0] ss:$48 sps:$4 sm:$0xff]   ;;  %v5377_v23 = vld [vmem:[%s6450_s2 + $0x674] ss:$48 sps:$4 sm:$0xff]  }
 0x11a   : > { %2714 = vmatprep.subr.bf16.mxu1 %v5291_v22  ;;  %v5374_v22 = vld [vmem:[%s6450_s2 + $0x74] ss:$48 sps:$4 sm:$0xff]  }
 0x11c   : > { %2742 = vmatpush1.bf16.msra.mxu0 %v5292_v25  ;;  %v5375_v25 = vld [vmem:[%s6450_s2 + $0x670] ss:$48 sps:$4 sm:$0xff]  }
 0x11d   : > { %2715 = vmatpush2.bf16.msra.mxu1 %v5289_v24  ;;  %2743 = vmatprep.subr.bf16.mxu0 %v5300_v28  ;;  %v5372_v24 = vld [vmem:[%s6450_s2 + $0x70] ss:$48 sps:$4 sm:$0xff]   ;;  %v5383_v28 = vld [vmem:[%s6450_s2 + $0x614] ss:$48 sps:$4 sm:$0xff]  }
 0x11e   : > { %2716 = vmatprep.subr.bf16.mxu1 %v5297_v27  ;;  %v5380_v27 = vld [vmem:[%s6450_s2 + $0x14] ss:$48 sps:$4 sm:$0xff]  }
 0x120   : > { %2744 = vmatpush1.bf16.msra.mxu0 %v5298_v30  ;;  %v5378_v30 = vld [vmem:[%s6450_s2 + $0x10] ss:$48 sps:$4 sm:$0xff]  }
 0x121   : > { %2717 = vmatpush2.bf16.msra.mxu1 %v5295_v29  ;;  %2745 = vmatprep.subr.bf16.mxu0 %v5306_v33  ;;  %v1101_v29 = vld [vmem:[%s6450_s2 + $0x910] sm:$0xff] }
 0x122   : > { %2718 = vmatprep.subr.bf16.mxu1 %v5303_v31  ;;  %v5381_v31 = vld [vmem:[%s6450_s2 + $0x610] ss:$48 sps:$4 sm:$0xff]   ;;  %v5386_v33 = vld [vmem:[%s6450_s2 + $0x5b4] ss:$48 sps:$4 sm:$0xff]  }
 0x124   : > { %2746 = vmatpush1.bf16.msra.mxu0 %v5304_v35  ;;  %v4852_v35 = vcombine.low %v1101_v29, %v1101_v29 }
 0x125   : > { %2719 = vmatpush2.bf16.msra.mxu1 %v5301_v34  ;;  %2747 = vmatprep.subr.bf16.mxu0 %v5312_v37  ;;  %v4853_v34 = vcombine.high %v1101_v29, %v1101_v29  ;;  %v5461_v29 = vld [vmem:[%s6450_s2 + $0x438] ss:$48 sps:$4 sm:$0xff]  }
 0x126   : > { %2720 = vmatprep.subr.bf16.mxu1 %v5309_v36  ;;  %v5384_v36 = vld [vmem:[%s6450_s2 + $0x5b0] ss:$48 sps:$4 sm:$0xff]   ;;  %v2593_v37 = vsel %vm2579_vm0, %v4852_v35, 0  ;;  %v5470_v35 = vld [vmem:[%s6450_s2 + $0x678] ss:$48 sps:$4 sm:$0xff]  }
 0x128   : > { %2748 = vmatpush1.bf16.msra.mxu0 %v5310_v39  ;;  %v5394_v39 = vld [vmem:[%s6450_s2 + $0x2bc] ss:$48 sps:$4 sm:$0xff]  }
 0x129   : > { %2721 = vmatpush2.bf16.msra.mxu1 %v5307_v38  ;;  %2749 = vmatprep.subr.bf16.mxu0 %v5318_v41  ;;  %v5391_v38 = vld [vmem:[%s6450_s2 + $0x554] ss:$48 sps:$4 sm:$0xff]   ;;  %v5392_v41 = vld [vmem:[%s6450_s2 + $0x2b8] ss:$48 sps:$4 sm:$0xff]  }
 0x12a   : > { %2722 = vmatprep.subr.bf16.mxu1 %v5315_v40  ;;  %v5389_v40 = vld [vmem:[%s6450_s2 + $0x550] ss:$48 sps:$4 sm:$0xff]  }
 0x12c   : > { %2750 = vmatpush1.bf16.msra.mxu0 %v5316_v43  ;;  %v5400_v43 = vld [vmem:[%s6450_s2 + $0x25c] ss:$48 sps:$4 sm:$0xff]  }
 0x12d   : > { %2723 = vmatpush2.bf16.msra.mxu1 %v5313_v42  ;;  %2751 = vmatprep.subr.bf16.mxu0 %v5324_v46  ;;  %v5397_v42 = vld [vmem:[%s6450_s2 + $0x4f4] ss:$48 sps:$4 sm:$0xff]   ;;  %v5398_v46 = vld [vmem:[%s6450_s2 + $0x258] ss:$48 sps:$4 sm:$0xff]  }
 0x12e   : > { %2724 = vmatprep.subr.bf16.mxu1 %v5321_v44  ;;  %v5395_v44 = vld [vmem:[%s6450_s2 + $0x4f0] ss:$48 sps:$4 sm:$0xff]  }
 0x130   : > { %2752 = vmatpush1.bf16.msra.mxu0 %v5322_v48  ;;  %v5406_v48 = vld [vmem:[%s6450_s2 + $0x1fc] ss:$48 sps:$4 sm:$0xff]  }
 0x131   : > { %2725 = vmatpush2.bf16.msra.mxu1 %v5319_v47  ;;  %2753 = vmatprep.subr.bf16.mxu0 %v5330_v51  ;;  %v5403_v47 = vld [vmem:[%s6450_s2 + $0x494] ss:$48 sps:$4 sm:$0xff]   ;;  %v5404_v51 = vld [vmem:[%s6450_s2 + $0x1f8] ss:$48 sps:$4 sm:$0xff]  }
 0x132   : > { %2726 = vmatprep.subr.bf16.mxu1 %v5327_v50  ;;  %v5401_v50 = vld [vmem:[%s6450_s2 + $0x490] ss:$48 sps:$4 sm:$0xff]  }
 0x134   : > { %2754 = vmatpush1.bf16.msra.mxu0 %v5328_v55  ;;  %v5407_v55 = vld [vmem:[%s6450_s2 + $0x430] ss:$48 sps:$4 sm:$0xff]  }
 0x135   : > { %2727 = vmatpush2.bf16.msra.mxu1 %v5325_v53  ;;  %4862 = vmatprep.subr.msk.bf16.mxu0 %vm2579_vm0, %v4851_v57  ;;  %v5412_v53 = vld [vmem:[%s6450_s2 + $0x19c] ss:$48 sps:$4 sm:$0xff]   ;;  %v5415_v57 = vld [vmem:[%s6450_s2 + $0x3d4] ss:$48 sps:$4 sm:$0xff]  }
 0x136   : > { %2728 = vmatprep.subr.bf16.mxu1 %v5333_v56  ;;  %v5410_v56 = vld [vmem:[%s6450_s2 + $0x198] ss:$48 sps:$4 sm:$0xff]  }
 0x138   : > { %2770 = vmatpush2.bf16.msra.mxu0 %v2587_v61  ;;  %v5421_v61 = vld [vmem:[%s6450_s2 + $0x374] ss:$48 sps:$4 sm:$0xff]  }
 0x139   : > { %2729 = vmatpush2.bf16.msra.mxu1 %v5331_v59  ;;  %2780 = vmatprep.subr.bf16.mxu0 %v5338_v60  ;;  %v5413_v59 = vld [vmem:[%s6450_s2 + $0x3d0] ss:$48 sps:$4 sm:$0xff]   ;;  %v5416_v60 = vld [vmem:[%s6450_s2 + $0x138] ss:$48 sps:$4 sm:$0xff]  }
 0x13a   : > { %2821 = vmatprep.subr.bf16.mxu1 %v5341_v62  ;;  %v5424_v62 = vld [vmem:[%s6450_s2 + $0xdc] ss:$48 sps:$4 sm:$0xff]  }
 0x13b   : > { %2772 = vmatmul.mubr.bf16.vlgmr.msra.gmra.mxu0 %v6552_v54 }
 0x13c   : > { %2731 = vmatmul.mubr.bf16.vlgmr.msra.gmra.mxu1 %v6586_v19  ;;  %2781 = vmatpush1.bf16.msra.mxu0 %v5336_v63  ;;  %v5419_v63 = vld [vmem:[%s6450_s2 + $0x370] ss:$48 sps:$4 sm:$0xff]  }
 0x13d   : > { %2822 = vmatpush1.bf16.msra.mxu1 %v5339_v0  ;;  %2782 = vmatprep.subr.bf16.mxu0 %v5344_v1  ;;  %v5422_v0 = vld [vmem:[%s6450_s2 + $0xd8] ss:$48 sps:$4 sm:$0xff]   ;;  %v5427_v1 = vld [vmem:[%s6450_s2 + $0x314] ss:$48 sps:$4 sm:$0xff]  }
 0x13e   : > { %2823 = vmatprep.subr.bf16.mxu1 %v5347_v2  ;;  %4865 = vmatprep.mubr.msk.bf16.mxu1 %vm2575_vm1, %v6542_v49  ;;  %v5430_v2 = vld [vmem:[%s6450_s2 + $0x7c] ss:$48 sps:$4 sm:$0xff]  }
 0x13f   : > { %2812 = vmatprep.mubr.bf16.mxu0 %v6539_v45 }
 0x140   : > { %2783 = vmatpush1.bf16.msra.mxu0 %v5342_v3  ;;  %v5425_v3 = vld [vmem:[%s6450_s2 + $0x310] ss:$48 sps:$4 sm:$0xff]  }
 0x141   : > { %2824 = vmatpush1.bf16.msra.mxu1 %v5345_v4  ;;  %2784 = vmatprep.subr.bf16.mxu0 %v5350_v5  ;;  %v5428_v4 = vld [vmem:[%s6450_s2 + $0x78] ss:$48 sps:$4 sm:$0xff]   ;;  %v5433_v5 = vld [vmem:[%s6450_s2 + $0x1c] ss:$48 sps:$4 sm:$0xff]  }
 0x142   : > { %2825 = vmatprep.subr.bf16.mxu1 %v5353_v6  ;;  %v5436_v6 = vld [vmem:[%s6450_s2 + $0x8bc] ss:$48 sps:$4 sm:$0xff]  }
 0x144   : > { %2785 = vmatpush1.bf16.msra.mxu0 %v5348_v7  ;;  %v5431_v7 = vld [vmem:[%s6450_s2 + $0x18] ss:$48 sps:$4 sm:$0xff]  }
 0x145   : > { %2826 = vmatpush1.bf16.msra.mxu1 %v5351_v8  ;;  %2786 = vmatprep.subr.bf16.mxu0 %v5356_v9  ;;  %v5434_v8 = vld [vmem:[%s6450_s2 + $0x8b8] ss:$48 sps:$4 sm:$0xff]   ;;  %v5439_v9 = vld [vmem:[%s6450_s2 + $0x5bc] ss:$48 sps:$4 sm:$0xff]  }
 0x146   : > { %2827 = vmatprep.subr.bf16.mxu1 %v5359_v10  ;;  %v5442_v10 = vld [vmem:[%s6450_s2 + $0x85c] ss:$48 sps:$4 sm:$0xff]  }
 0x148   : > { %2787 = vmatpush1.bf16.msra.mxu0 %v5354_v11  ;;  %v5437_v11 = vld [vmem:[%s6450_s2 + $0x5b8] ss:$48 sps:$4 sm:$0xff]  }
 0x149   : > { %2828 = vmatpush1.bf16.msra.mxu1 %v5357_v12  ;;  %2788 = vmatprep.subr.bf16.mxu0 %v5362_v13  ;;  %v5440_v12 = vld [vmem:[%s6450_s2 + $0x858] ss:$48 sps:$4 sm:$0xff]   ;;  %v5445_v13 = vld [vmem:[%s6450_s2 + $0x55c] ss:$48 sps:$4 sm:$0xff]  }
 0x14a   : > { %2829 = vmatprep.subr.bf16.mxu1 %v5365_v14  ;;  %v5448_v14 = vld [vmem:[%s6450_s2 + $0x7fc] ss:$48 sps:$4 sm:$0xff]  }
 0x14c   : > { %2789 = vmatpush1.bf16.msra.mxu0 %v5360_v15  ;;  %v5443_v15 = vld [vmem:[%s6450_s2 + $0x558] ss:$48 sps:$4 sm:$0xff]  }
 0x14d   : > { %2830 = vmatpush1.bf16.msra.mxu1 %v5363_v16  ;;  %2790 = vmatprep.subr.bf16.mxu0 %v5368_v17  ;;  %v5446_v16 = vld [vmem:[%s6450_s2 + $0x7f8] ss:$48 sps:$4 sm:$0xff]   ;;  %v5451_v17 = vld [vmem:[%s6450_s2 + $0x4fc] ss:$48 sps:$4 sm:$0xff]  }
 0x14e   : > { %2831 = vmatprep.subr.bf16.mxu1 %v5371_v18  ;;  %v5454_v18 = vld [vmem:[%s6450_s2 + $0x79c] ss:$48 sps:$4 sm:$0xff]  }
 0x150   : > { %2791 = vmatpush1.bf16.msra.mxu0 %v5366_v20  ;;  %v5449_v20 = vld [vmem:[%s6450_s2 + $0x4f8] ss:$48 sps:$4 sm:$0xff]  }
 0x151   : > { %2832 = vmatpush1.bf16.msra.mxu1 %v5369_v21  ;;  %2792 = vmatprep.subr.bf16.mxu0 %v5374_v22  ;;  %v5452_v21 = vld [vmem:[%s6450_s2 + $0x798] ss:$48 sps:$4 sm:$0xff]   ;;  %v5457_v22 = vld [vmem:[%s6450_s2 + $0x49c] ss:$48 sps:$4 sm:$0xff]  }
 0x152   : > { %2833 = vmatprep.subr.bf16.mxu1 %v5377_v23  ;;  %v5460_v23 = vld [vmem:[%s6450_s2 + $0x73c] ss:$48 sps:$4 sm:$0xff]  }
 0x154   : > { %2793 = vmatpush1.bf16.msra.mxu0 %v5372_v24  ;;  %v5455_v24 = vld [vmem:[%s6450_s2 + $0x498] ss:$48 sps:$4 sm:$0xff]  }
 0x155   : > { %2834 = vmatpush1.bf16.msra.mxu1 %v5375_v25  ;;  %2794 = vmatprep.subr.bf16.mxu0 %v5380_v27  ;;  %v5458_v25 = vld [vmem:[%s6450_s2 + $0x738] ss:$48 sps:$4 sm:$0xff]   ;;  %v5463_v27 = vld [vmem:[%s6450_s2 + $0x43c] ss:$48 sps:$4 sm:$0xff]  }
 0x156   : > { %2835 = vmatprep.subr.bf16.mxu1 %v5383_v28  ;;  %v5466_v28 = vld [vmem:[%s6450_s2 + $0x6dc] ss:$48 sps:$4 sm:$0xff]  }
 0x158   : > { %2795 = vmatpush1.bf16.msra.mxu0 %v5378_v30  ;;  %v5464_v30 = vld [vmem:[%s6450_s2 + $0x6d8] ss:$48 sps:$4 sm:$0xff]  }
 0x159   : > { %2836 = vmatpush1.bf16.msra.mxu1 %v5381_v31  ;;  %2796 = vmatprep.subr.bf16.mxu0 %v5386_v33  ;;  %v5469_v31 = vld [vmem:[%s6450_s2 + $0x3dc] ss:$48 sps:$4 sm:$0xff]  }
 0x15a   : > { %4864 = vmatprep.subr.msk.bf16.mxu1 %vm2579_vm0, %v4853_v34  ;;  %v5472_v33 = vld [vmem:[%s6450_s2 + $0x67c] ss:$48 sps:$4 sm:$0xff]   ;;  %v5467_v34 = vld [vmem:[%s6450_s2 + $0x3d8] ss:$48 sps:$4 sm:$0xff]  }
 0x15c   : > { %2797 = vmatpush2.bf16.msra.mxu0 %v5384_v36  ;;  %v5475_v36 = vld [vmem:[%s6450_s2 + $0x37c] ss:$48 sps:$4 sm:$0xff]  }
 0x15d   : > { %2852 = vmatpush2.bf16.msra.mxu1 %v2593_v37  ;;  %2798 = vmatprep.subr.bf16.mxu0 %v5391_v38  ;;  %v5478_v37 = vld [vmem:[%s6450_s2 + $0x61c] ss:$48 sps:$4 sm:$0xff]  }
 0x15e   : > { %2862 = vmatprep.subr.bf16.mxu1 %v5394_v39  ;;  %v1102_v38 = vld [vmem:[%s6450_s2 + $0x918] sm:$0xff] }
 0x15f   : > { %v5473_v39 = vld [vmem:[%s6450_s2 + $0x378] ss:$48 sps:$4 sm:$0xff]  }
 0x160   : > { %2854 = vmatmul.mubr.bf16.vlgmr.msra.gmra.mxu1 %v6552_v54  ;;  %2799 = vmatpush2.bf16.msra.mxu0 %v5389_v40  ;;  %v5476_v40 = vld [vmem:[%s6450_s2 + $0x618] ss:$48 sps:$4 sm:$0xff]  }
 0x161   : > { %2863 = vmatpush1.bf16.msra.mxu1 %v5392_v41  ;;  %2800 = vmatprep.subr.bf16.mxu0 %v5397_v42  ;;  %v5481_v41 = vld [vmem:[%s6450_s2 + $0x31c] ss:$48 sps:$4 sm:$0xff]   ;;  %v4855_v42 = vcombine.high %v1102_v38, %v1102_v38 }
 0x162   : > { %2864 = vmatprep.subr.bf16.mxu1 %v5400_v43  ;;  %2894 = vmatprep.mubr.bf16.mxu1 %v6539_v45  ;;  %v4854_v43 = vcombine.low %v1102_v38, %v1102_v38  ;;  %v5551_v38 = vld [vmem:[%s6450_s2 + $0x4a4] ss:$48 sps:$4 sm:$0xff]  }
 0x164   : > { %2801 = vmatpush2.bf16.msra.mxu0 %v5395_v44  ;;  %v5479_v44 = vld [vmem:[%s6450_s2 + $0x318] ss:$48 sps:$4 sm:$0xff]  }
 0x165   : > { %2865 = vmatpush1.bf16.msra.mxu1 %v5398_v46  ;;  %2802 = vmatprep.subr.bf16.mxu0 %v5403_v47  ;;  %v5486_v46 = vld [vmem:[%s6450_s2 + $0x2c4] ss:$48 sps:$4 sm:$0xff]  }
 0x166   : > { %2866 = vmatprep.subr.bf16.mxu1 %v5406_v48  ;;  %v5489_v47 = vld [vmem:[%s6450_s2 + $0x8c4] ss:$48 sps:$4 sm:$0xff]   ;;  %v2599_v48 = vsel %vm2579_vm0, %v4854_v43, 0  ;;  %v5560_v43 = vld [vmem:[%s6450_s2 + $0x1ac] ss:$48 sps:$4 sm:$0xff]  }
 0x168   : > { %2803 = vmatpush2.bf16.msra.mxu0 %v5401_v50  ;;  %v5484_v50 = vld [vmem:[%s6450_s2 + $0x2c0] ss:$48 sps:$4 sm:$0xff]  }
 0x169   : > { %2867 = vmatpush1.bf16.msra.mxu1 %v5404_v51  ;;  %2804 = vmatprep.subr.bf16.mxu0 %v5409_v52  ;;  %v5487_v51 = vld [vmem:[%s6450_s2 + $0x8c0] ss:$48 sps:$4 sm:$0xff]   ;;  %v5492_v52 = vld [vmem:[%s6450_s2 + $0x264] ss:$48 sps:$4 sm:$0xff]  }
 0x16a   : > { %2868 = vmatprep.subr.bf16.mxu1 %v5412_v53  ;;  %v5495_v53 = vld [vmem:[%s6450_s2 + $0x864] ss:$48 sps:$4 sm:$0xff]  }
 0x16c   : > { %2805 = vmatpush2.bf16.msra.mxu0 %v5407_v55  ;;  %v5490_v55 = vld [vmem:[%s6450_s2 + $0x260] ss:$48 sps:$4 sm:$0xff]  }
 0x16d   : > { %2869 = vmatpush1.bf16.msra.mxu1 %v5410_v56  ;;  %2806 = vmatprep.subr.bf16.mxu0 %v5415_v57  ;;  %v5493_v56 = vld [vmem:[%s6450_s2 + $0x860] ss:$48 sps:$4 sm:$0xff]   ;;  %v5498_v57 = vld [vmem:[%s6450_s2 + $0x204] ss:$48 sps:$4 sm:$0xff]  }
 0x16e   : > { %2870 = vmatprep.subr.bf16.mxu1 %v5418_v58  ;;  %v5501_v58 = vld [vmem:[%s6450_s2 + $0x804] ss:$48 sps:$4 sm:$0xff]  }
 0x170   : > { %2807 = vmatpush2.bf16.msra.mxu0 %v5413_v59  ;;  %v5496_v59 = vld [vmem:[%s6450_s2 + $0x200] ss:$48 sps:$4 sm:$0xff]  }
 0x171   : > { %2871 = vmatpush1.bf16.msra.mxu1 %v5416_v60  ;;  %2808 = vmatprep.subr.bf16.mxu0 %v5421_v61  ;;  %v5499_v60 = vld [vmem:[%s6450_s2 + $0x800] ss:$48 sps:$4 sm:$0xff]   ;;  %v5504_v61 = vld [vmem:[%s6450_s2 + $0x1a4] ss:$48 sps:$4 sm:$0xff]  }
 0x172   : > { %2872 = vmatprep.subr.bf16.mxu1 %v5424_v62  ;;  %v5507_v62 = vld [vmem:[%s6450_s2 + $0x7a4] ss:$48 sps:$4 sm:$0xff]  }
 0x174   : > { %2809 = vmatpush2.bf16.msra.mxu0 %v5419_v63  ;;  %v5502_v63 = vld [vmem:[%s6450_s2 + $0x1a0] ss:$48 sps:$4 sm:$0xff]  }
 0x175   : > { %2873 = vmatpush1.bf16.msra.mxu1 %v5422_v0  ;;  %2810 = vmatprep.subr.bf16.mxu0 %v5427_v1  ;;  %v5505_v0 = vld [vmem:[%s6450_s2 + $0x7a0] ss:$48 sps:$4 sm:$0xff]   ;;  %v5510_v1 = vld [vmem:[%s6450_s2 + $0x144] ss:$48 sps:$4 sm:$0xff]  }
 0x176   : > { %2874 = vmatprep.subr.bf16.mxu1 %v5430_v2  ;;  %v5513_v2 = vld [vmem:[%s6450_s2 + $0x744] ss:$48 sps:$4 sm:$0xff]  }
 0x178   : > { %2811 = vmatpush2.bf16.msra.mxu0 %v5425_v3  ;;  %v5508_v3 = vld [vmem:[%s6450_s2 + $0x140] ss:$48 sps:$4 sm:$0xff]  }
 0x179   : > { %2875 = vmatpush1.bf16.msra.mxu1 %v5428_v4  ;;  %2903 = vmatprep.subr.bf16.mxu0 %v5436_v6  ;;  %v5511_v4 = vld [vmem:[%s6450_s2 + $0x740] ss:$48 sps:$4 sm:$0xff]   ;;  %v5519_v6 = vld [vmem:[%s6450_s2 + $0x6e4] ss:$48 sps:$4 sm:$0xff]  }
 0x17a   : > { %2876 = vmatprep.subr.bf16.mxu1 %v5433_v5  ;;  %v5516_v5 = vld [vmem:[%s6450_s2 + $0xe4] ss:$48 sps:$4 sm:$0xff]  }
 0x17b   : > { %2813 = vmatmul.mubr.bf16.vlgmr.msra.gmra.mxu0 %v6586_v19 }
 0x17c   : > { %2904 = vmatpush1.bf16.msra.mxu0 %v5434_v8  ;;  %4867 = vmatprep.mubr.msk.bf16.mxu0 %vm2575_vm1, %v6542_v49  ;;  %v5517_v8 = vld [vmem:[%s6450_s2 + $0x6e0] ss:$48 sps:$4 sm:$0xff]  }
 0x17d   : > { %2877 = vmatpush1.bf16.msra.mxu1 %v5431_v7  ;;  %2905 = vmatprep.subr.bf16.mxu0 %v5442_v10  ;;  %v5514_v7 = vld [vmem:[%s6450_s2 + $0xe0] ss:$48 sps:$4 sm:$0xff]   ;;  %v5525_v10 = vld [vmem:[%s6450_s2 + $0x684] ss:$48 sps:$4 sm:$0xff]  }
 0x17e   : > { %2878 = vmatprep.subr.bf16.mxu1 %v5439_v9  ;;  %v5522_v9 = vld [vmem:[%s6450_s2 + $0x84] ss:$48 sps:$4 sm:$0xff]  }
 0x180   : > { %2906 = vmatpush1.bf16.msra.mxu0 %v5440_v12  ;;  %v5523_v12 = vld [vmem:[%s6450_s2 + $0x680] ss:$48 sps:$4 sm:$0xff]  }
 0x181   : > { %2879 = vmatpush2.bf16.msra.mxu1 %v5437_v11  ;;  %2907 = vmatprep.subr.bf16.mxu0 %v5448_v14  ;;  %v5520_v11 = vld [vmem:[%s6450_s2 + $0x80] ss:$48 sps:$4 sm:$0xff]   ;;  %v5531_v14 = vld [vmem:[%s6450_s2 + $0x624] ss:$48 sps:$4 sm:$0xff]  }
 0x182   : > { %2880 = vmatprep.subr.bf16.mxu1 %v5445_v13  ;;  %v5528_v13 = vld [vmem:[%s6450_s2 + $0x24] ss:$48 sps:$4 sm:$0xff]  }
 0x184   : > { %2908 = vmatpush1.bf16.msra.mxu0 %v5446_v16  ;;  %v5526_v16 = vld [vmem:[%s6450_s2 + $0x20] ss:$48 sps:$4 sm:$0xff]  }
 0x185   : > { %2881 = vmatpush2.bf16.msra.mxu1 %v5443_v15  ;;  %2909 = vmatprep.subr.bf16.mxu0 %v5454_v18  ;;  %v1103_v15 = vld [vmem:[%s6450_s2 + $0x920] sm:$0xff] }
 0x186   : > { %2882 = vmatprep.subr.bf16.mxu1 %v5451_v17  ;;  %v5529_v17 = vld [vmem:[%s6450_s2 + $0x620] ss:$48 sps:$4 sm:$0xff]   ;;  %v5534_v18 = vld [vmem:[%s6450_s2 + $0x5c4] ss:$48 sps:$4 sm:$0xff]  }
 0x188   : > { %2910 = vmatpush1.bf16.msra.mxu0 %v5452_v21  ;;  %v4856_v21 = vcombine.low %v1103_v15, %v1103_v15 }
 0x189   : > { %2883 = vmatpush2.bf16.msra.mxu1 %v5449_v20  ;;  %2911 = vmatprep.subr.bf16.mxu0 %v5460_v23  ;;  %v4857_v20 = vcombine.high %v1103_v15, %v1103_v15  ;;  %v5532_v23 = vld [vmem:[%s6450_s2 + $0x5c0] ss:$48 sps:$4 sm:$0xff]   ;;  %v5602_v15 = vld [vmem:[%s6450_s2 + $0x7ac] ss:$48 sps:$4 sm:$0xff]  }
 0x18a   : > { %2884 = vmatprep.subr.bf16.mxu1 %v5457_v22 }
 0x18c   : > { %2912 = vmatpush1.bf16.msra.mxu0 %v5458_v25  ;;  %v2605_v25 = vsel %vm2579_vm0, %v4856_v21, 0  ;;  %v5606_v21 = vld [vmem:[%s6450_s2 + $0x748] ss:$48 sps:$4 sm:$0xff]  }
 0x18d   : > { %2885 = vmatpush2.bf16.msra.mxu1 %v5455_v24  ;;  %2913 = vmatprep.subr.bf16.mxu0 %v5466_v28  ;;  %v5542_v28 = vld [vmem:[%s6450_s2 + $0x2cc] ss:$48 sps:$4 sm:$0xff]  }
 0x18e   : > { %2886 = vmatprep.subr.bf16.mxu1 %v5463_v27  ;;  %v5539_v27 = vld [vmem:[%s6450_s2 + $0x564] ss:$48 sps:$4 sm:$0xff]  }
 0x190   : > { %2914 = vmatpush1.bf16.msra.mxu0 %v5464_v30  ;;  %v5537_v30 = vld [vmem:[%s6450_s2 + $0x560] ss:$48 sps:$4 sm:$0xff]  }
 0x191   : > { %2887 = vmatpush2.bf16.msra.mxu1 %v5461_v29  ;;  %2915 = vmatprep.subr.bf16.mxu0 %v5472_v33 }
 0x192   : > { %2888 = vmatprep.subr.bf16.mxu1 %v5469_v31  ;;  %v5540_v31 = vld [vmem:[%s6450_s2 + $0x2c8] ss:$48 sps:$4 sm:$0xff]  }
 0x194   : > { %2916 = vmatpush1.bf16.msra.mxu0 %v5470_v35  ;;  %v5548_v35 = vld [vmem:[%s6450_s2 + $0x26c] ss:$48 sps:$4 sm:$0xff]  }
 0x195   : > { %2889 = vmatpush2.bf16.msra.mxu1 %v5467_v34  ;;  %2917 = vmatprep.subr.bf16.mxu0 %v5478_v37  ;;  %v5545_v34 = vld [vmem:[%s6450_s2 + $0x504] ss:$48 sps:$4 sm:$0xff]   ;;  %v5546_v37 = vld [vmem:[%s6450_s2 + $0x268] ss:$48 sps:$4 sm:$0xff]  }
 0x196   : > { %2890 = vmatprep.subr.bf16.mxu1 %v5475_v36  ;;  %v5543_v36 = vld [vmem:[%s6450_s2 + $0x500] ss:$48 sps:$4 sm:$0xff]  }
 0x198   : > { %2918 = vmatpush1.bf16.msra.mxu0 %v5476_v40  ;;  %v5549_v40 = vld [vmem:[%s6450_s2 + $0x4a0] ss:$48 sps:$4 sm:$0xff]  }
 0x199   : > { %2891 = vmatpush2.bf16.msra.mxu1 %v5473_v39  ;;  %4866 = vmatprep.subr.msk.bf16.mxu0 %vm2579_vm0, %v4855_v42  ;;  %v5554_v39 = vld [vmem:[%s6450_s2 + $0x20c] ss:$48 sps:$4 sm:$0xff]   ;;  %v5557_v42 = vld [vmem:[%s6450_s2 + $0x444] ss:$48 sps:$4 sm:$0xff]  }
 0x19a   : > { %2892 = vmatprep.subr.bf16.mxu1 %v5481_v41  ;;  %v5552_v41 = vld [vmem:[%s6450_s2 + $0x208] ss:$48 sps:$4 sm:$0xff]  }
 0x19c   : > { %2934 = vmatpush2.bf16.msra.mxu0 %v2599_v48  ;;  %v5561_v48 = vld [vmem:[%s6450_s2 + $0x3e0] ss:$48 sps:$4 sm:$0xff]  }
 0x19d   : > { %2893 = vmatpush2.bf16.msra.mxu1 %v5479_v44  ;;  %2944 = vmatprep.subr.bf16.mxu0 %v5486_v46  ;;  %v5555_v44 = vld [vmem:[%s6450_s2 + $0x440] ss:$48 sps:$4 sm:$0xff]   ;;  %v5558_v46 = vld [vmem:[%s6450_s2 + $0x1a8] ss:$48 sps:$4 sm:$0xff]  }
 0x19e   : > { %2985 = vmatprep.subr.bf16.mxu1 %v5489_v47  ;;  %v5566_v47 = vld [vmem:[%s6450_s2 + $0x14c] ss:$48 sps:$4 sm:$0xff]  }
 0x19f   : > { %2936 = vmatmul.mubr.bf16.vlgmr.msra.gmra.mxu0 %v6552_v54 }
 0x1a0   : > { %2895 = vmatmul.mubr.bf16.vlgmr.msra.gmra.mxu1 %v6586_v19  ;;  %2945 = vmatpush1.bf16.msra.mxu0 %v5484_v50  ;;  %v5564_v50 = vld [vmem:[%s6450_s2 + $0x148] ss:$48 sps:$4 sm:$0xff]  }
 0x1a1   : > { %2986 = vmatpush1.bf16.msra.mxu1 %v5487_v51  ;;  %2946 = vmatprep.subr.bf16.mxu0 %v5492_v52  ;;  %v5569_v51 = vld [vmem:[%s6450_s2 + $0x384] ss:$48 sps:$4 sm:$0xff]   ;;  %v5572_v52 = vld [vmem:[%s6450_s2 + $0xec] ss:$48 sps:$4 sm:$0xff]  }
 0x1a2   : > { %2987 = vmatprep.subr.bf16.mxu1 %v5495_v53  ;;  %4869 = vmatprep.mubr.msk.bf16.mxu1 %vm2575_vm1, %v6542_v49  ;;  %v5567_v53 = vld [vmem:[%s6450_s2 + $0x380] ss:$48 sps:$4 sm:$0xff]  }
 0x1a3   : > { %2976 = vmatprep.mubr.bf16.mxu0 %v6539_v45 }
 0x1a4   : > { %2947 = vmatpush1.bf16.msra.mxu0 %v5490_v55  ;;  %v5570_v55 = vld [vmem:[%s6450_s2 + $0xe8] ss:$48 sps:$4 sm:$0xff]  }
 0x1a5   : > { %2988 = vmatpush1.bf16.msra.mxu1 %v5493_v56  ;;  %2948 = vmatprep.subr.bf16.mxu0 %v5498_v57  ;;  %v5575_v56 = vld [vmem:[%s6450_s2 + $0x324] ss:$48 sps:$4 sm:$0xff]   ;;  %v5578_v57 = vld [vmem:[%s6450_s2 + $0x8c] ss:$48 sps:$4 sm:$0xff]  }
 0x1a6   : > { %2989 = vmatprep.subr.bf16.mxu1 %v5501_v58 }
 0x1a8   : > { %2949 = vmatpush1.bf16.msra.mxu0 %v5496_v59 }
 0x1a9   : > { %2990 = vmatpush1.bf16.msra.mxu1 %v5499_v60  ;;  %2950 = vmatprep.subr.bf16.mxu0 %v5504_v61  ;;  %v5573_v60 = vld [vmem:[%s6450_s2 + $0x320] ss:$48 sps:$4 sm:$0xff]   ;;  %v5576_v61 = vld [vmem:[%s6450_s2 + $0x88] ss:$48 sps:$4 sm:$0xff]  }
 0x1aa   : > { %2991 = vmatprep.subr.bf16.mxu1 %v5507_v62 }
 0x1ac   : > { %2951 = vmatpush1.bf16.msra.mxu0 %v5502_v63  ;;  %v5581_v63 = vld [vmem:[%s6450_s2 + $0x2c] ss:$48 sps:$4 sm:$0xff]  }
 0x1ad   : > { %2992 = vmatpush1.bf16.msra.mxu1 %v5505_v0  ;;  %2952 = vmatprep.subr.bf16.mxu0 %v5510_v1  ;;  %v5584_v0 = vld [vmem:[%s6450_s2 + $0x8cc] ss:$48 sps:$4 sm:$0xff]  }
 0x1ae   : > { %2993 = vmatprep.subr.bf16.mxu1 %v5513_v2 }
 0x1b0   : > { %2953 = vmatpush1.bf16.msra.mxu0 %v5508_v3  ;;  %v5579_v3 = vld [vmem:[%s6450_s2 + $0x28] ss:$48 sps:$4 sm:$0xff]  }
 0x1b1   : > { %2994 = vmatpush1.bf16.msra.mxu1 %v5511_v4  ;;  %2954 = vmatprep.subr.bf16.mxu0 %v5516_v5  ;;  %v5582_v4 = vld [vmem:[%s6450_s2 + $0x8c8] ss:$48 sps:$4 sm:$0xff]  }
 0x1b2   : > { %2995 = vmatprep.subr.bf16.mxu1 %v5519_v6  ;;  %v5587_v6 = vld [vmem:[%s6450_s2 + $0x5cc] ss:$48 sps:$4 sm:$0xff]  }
 0x1b4   : > { %2955 = vmatpush1.bf16.msra.mxu0 %v5514_v7  ;;  %v5590_v7 = vld [vmem:[%s6450_s2 + $0x86c] ss:$48 sps:$4 sm:$0xff]  }
 0x1b5   : > { %2996 = vmatpush1.bf16.msra.mxu1 %v5517_v8  ;;  %2956 = vmatprep.subr.bf16.mxu0 %v5522_v9  ;;  %v5585_v8 = vld [vmem:[%s6450_s2 + $0x5c8] ss:$48 sps:$4 sm:$0xff]  }
 0x1b6   : > { %2997 = vmatprep.subr.bf16.mxu1 %v5525_v10  ;;  %v5588_v9 = vld [vmem:[%s6450_s2 + $0x868] ss:$48 sps:$4 sm:$0xff]   ;;  %v5593_v10 = vld [vmem:[%s6450_s2 + $0x56c] ss:$48 sps:$4 sm:$0xff]  }
 0x1b8   : > { %2957 = vmatpush1.bf16.msra.mxu0 %v5520_v11  ;;  %v5596_v11 = vld [vmem:[%s6450_s2 + $0x80c] ss:$48 sps:$4 sm:$0xff]  }
 0x1b9   : > { %2998 = vmatpush1.bf16.msra.mxu1 %v5523_v12  ;;  %2958 = vmatprep.subr.bf16.mxu0 %v5528_v13  ;;  %v5591_v12 = vld [vmem:[%s6450_s2 + $0x568] ss:$48 sps:$4 sm:$0xff]  }
 0x1ba   : > { %2999 = vmatprep.subr.bf16.mxu1 %v5531_v14  ;;  %v5594_v13 = vld [vmem:[%s6450_s2 + $0x808] ss:$48 sps:$4 sm:$0xff]   ;;  %v5599_v14 = vld [vmem:[%s6450_s2 + $0x50c] ss:$48 sps:$4 sm:$0xff]  }
 0x1bc   : > { %v6777_v22 = vpop.f32.mrf.mxu1  ;;  %2959 = vmatpush1.bf16.msra.mxu0 %v5526_v16  ;;  %v5597_v16 = vld [vmem:[%s6450_s2 + $0x508] ss:$48 sps:$4 sm:$0xff]  }
 0x1bd   : > { %3000 = vmatpush1.bf16.msra.mxu1 %v5529_v17  ;;  %2960 = vmatprep.subr.bf16.mxu0 %v5534_v18  ;;  %v5600_v17 = vld [vmem:[%s6450_s2 + $0x7a8] ss:$48 sps:$4 sm:$0xff]   ;;  %v5608_v18 = vld [vmem:[%s6450_s2 + $0x74c] ss:$48 sps:$4 sm:$0xff]  }
 0x1be   : > { %v6780_v24 = vpop.f32.mrf.mxu1  ;;  %4868 = vmatprep.subr.msk.bf16.mxu1 %vm2579_vm0, %v4857_v20  ;;  %v5603_v20 = vld [vmem:[%s6450_s2 + $0x4a8] ss:$48 sps:$4 sm:$0xff]  }
 0x1c0   : > { %v2695_v29 = vpop.f32.mrf.mxu1  ;;  %2961 = vmatpush2.bf16.msra.mxu0 %v5532_v23  ;;  %v5614_v23 = vld [vmem:[%s6450_s2 + $0x6ec] ss:$48 sps:$4 sm:$0xff]  }
 0x1c1   : > { %3016 = vmatpush2.bf16.msra.mxu1 %v2605_v25  ;;  %2962 = vmatprep.subr.bf16.mxu0 %v5539_v27  ;;  %v5612_v25 = vld [vmem:[%s6450_s2 + $0x6e8] ss:$48 sps:$4 sm:$0xff]   ;;  %v5617_v27 = vld [vmem:[%s6450_s2 + $0x3ec] ss:$48 sps:$4 sm:$0xff]  }
 0x1c2   : > { %v2696_v33 = vpop.f32.mrf.mxu1  ;;  %3026 = vmatprep.subr.bf16.mxu1 %v5542_v28  ;;  %v5620_v28 = vld [vmem:[%s6450_s2 + $0x68c] ss:$48 sps:$4 sm:$0xff]   ;;  %v5615_v29 = vld [vmem:[%s6450_s2 + $0x3e8] ss:$48 sps:$4 sm:$0xff]  }
 0x1c3   : > { %v5626_v33 = vld [vmem:[%s6450_s2 + $0x62c] ss:$48 sps:$4 sm:$0xff]  }
 0x1c4   : > { %3018 = vmatmul.mubr.bf16.vlgmr.msra.gmra.mxu1 %v6552_v54  ;;  %2963 = vmatpush2.bf16.msra.mxu0 %v5537_v30  ;;  %v5618_v30 = vld [vmem:[%s6450_s2 + $0x688] ss:$48 sps:$4 sm:$0xff]  }
 0x1c5   : > { %3027 = vmatpush1.bf16.msra.mxu1 %v5540_v31  ;;  %2964 = vmatprep.subr.bf16.mxu0 %v5545_v34  ;;  %v5623_v31 = vld [vmem:[%s6450_s2 + $0x38c] ss:$48 sps:$4 sm:$0xff]  }
 0x1c6   : > { %3028 = vmatprep.subr.bf16.mxu1 %v5548_v35  ;;  %3058 = vmatprep.mubr.bf16.mxu1 %v6539_v45  ;;  %v5563_v45 = vld [vmem:[%s6450_s2 + $0x3e4] ss:$48 sps:$4 sm:$0xff]   ;;  %v1104_v34 = vld [vmem:[%s6450_s2 + $0x928] sm:$0xff] }
 0x1c7   : > { %v5621_v35 = vld [vmem:[%s6450_s2 + $0x388] ss:$48 sps:$4 sm:$0xff]  }
 0x1c8   : > { %2965 = vmatpush2.bf16.msra.mxu0 %v5543_v36  ;;  %v5624_v36 = vld [vmem:[%s6450_s2 + $0x628] ss:$48 sps:$4 sm:$0xff]  }
 0x1c9   : > { %3029 = vmatpush1.bf16.msra.mxu1 %v5546_v37  ;;  %2966 = vmatprep.subr.bf16.mxu0 %v5551_v38  ;;  %v5629_v37 = vld [vmem:[%s6450_s2 + $0x32c] ss:$48 sps:$4 sm:$0xff]   ;;  %v4859_v38 = vcombine.high %v1104_v34, %v1104_v34 }
 0x1ca   : > { %3030 = vmatprep.subr.bf16.mxu1 %v5554_v39  ;;  %v4858_v39 = vcombine.low %v1104_v34, %v1104_v34 }
 0x1cc   : > { %2967 = vmatpush2.bf16.msra.mxu0 %v5549_v40 }
 0x1cd   : > { %3031 = vmatpush1.bf16.msra.mxu1 %v5552_v41  ;;  %2968 = vmatprep.subr.bf16.mxu0 %v5557_v42 }
 0x1ce   : > { %3032 = vmatprep.subr.bf16.mxu1 %v5560_v43  ;;  %v5627_v43 = vld [vmem:[%s6450_s2 + $0x328] ss:$48 sps:$4 sm:$0xff]  }
 0x1d0   : > { %2969 = vmatpush2.bf16.msra.mxu0 %v5555_v44 }
 0x1d1   : > { %3033 = vmatpush1.bf16.msra.mxu1 %v5558_v46  ;;  %2970 = vmatprep.subr.bf16.mxu0 %v5563_v45  ;;  %v2611_v45 = vsel %vm2579_vm0, %v4858_v39, 0 }
 0x1d2   : > { %3034 = vmatprep.subr.bf16.mxu1 %v5566_v47 }
 0x1d4   : > { %2971 = vmatpush2.bf16.msra.mxu0 %v5561_v48 }
 0x1d5   : > { %3035 = vmatpush1.bf16.msra.mxu1 %v5564_v50  ;;  %2972 = vmatprep.subr.bf16.mxu0 %v5569_v51 }
 0x1d6   : > { %3036 = vmatprep.subr.bf16.mxu1 %v5572_v52 }
 0x1d7   : > { %v2650_v58 = vpop.f32.mrf.mxu0 }
 0x1d8   : > { %v6813_v59 = vadd.f32 %v6777_v22, %v2650_v58  ;;  %2973 = vmatpush2.bf16.msra.mxu0 %v5567_v53  ;;  %v5611_v22 = vld [vmem:[%s6450_s2 + $0x44c] ss:$48 sps:$4 sm:$0xff]  }
 0x1d9   : > { %3037 = vmatpush1.bf16.msra.mxu1 %v5570_v55  ;;  %v2652_v62 = vpop.f32.mrf.mxu0  ;;  %2974 = vmatprep.subr.bf16.mxu0 %v5575_v56  ;;  %v5632_v55 = vld [vmem:[%s6466_s15 + $0x70] ss:$8 sps:$4 sm:$0xff]   ;;  %v5634_v56 = vld [vmem:[%s6466_s15 + $0x74] ss:$8 sps:$4 sm:$0xff]   ;;  %v5635_v58 = vld [vmem:[%s6466_s15 + $0x60] ss:$8 sps:$4 sm:$0xff]  }
 0x1da   : > { %3038 = vmatprep.subr.bf16.mxu1 %v5578_v57  ;;  %v6820_v1 = vadd.f32 %v6780_v24, %v2652_v62  ;;  %v5609_v24 = vld [vmem:[%s6450_s2 + $0x448] ss:$48 sps:$4 sm:$0xff]  }
 0x1db   : > { %v2654_v2 = vpop.f32.mrf.mxu0  ;;  %v5637_v57 = vld [vmem:[%s6466_s15 + $0x64] ss:$8 sps:$4 sm:$0xff]  }
 0x1dc   : > { %2975 = vmatpush2.bf16.msra.mxu0 %v5573_v60  ;;  %v5640_v60 = vld [vmem:[%s6466_s15 + $0x54] ss:$8 sps:$4 sm:$0xff]   ;;  %v5643_v62 = vld [vmem:[%s6466_s15 + $0x44] ss:$8 sps:$4 sm:$0xff]  }
 0x1dd   : > { %3039 = vmatpush1.bf16.msra.mxu1 %v5576_v61  ;;  %v2655_v5 = vpop.f32.mrf.mxu0  ;;  %3067 = vmatprep.subr.bf16.mxu0 %v5584_v0  ;;  %v5638_v61 = vld [vmem:[%s6466_s15 + $0x50] ss:$8 sps:$4 sm:$0xff]  }
 0x1de   : > { %3040 = vmatprep.subr.bf16.mxu1 %v5581_v63  ;;  %v5646_v63 = vld [vmem:[%s6466_s15 + $0x34] ss:$8 sps:$4 sm:$0xff]   ;;  %v5644_v0 = vld [vmem:[%s6466_s15 + $0x30] ss:$8 sps:$4 sm:$0xff]   ;;  %v5647_v5 = vld [vmem:[%s6466_s15 + $0x20] ss:$8 sps:$4 sm:$0xff]  }
 0x1df   : > { %2977 = vmatmul.mubr.bf16.vlgmr.msra.gmra.mxu0 %v6586_v19 }
 0x1e0   : > { %3068 = vmatpush1.bf16.msra.mxu0 %v5582_v4  ;;  %4871 = vmatprep.mubr.msk.bf16.mxu0 %vm2575_vm1, %v6542_v49  ;;  %v5605_v49 = vld [vmem:[%s6450_s2 + $0x4ac] ss:$48 sps:$4 sm:$0xff]   ;;  %s5001_s2 = sshll.u32 %s6978_s16, 7 }
 0x1e1   : > { %3041 = vmatpush1.bf16.msra.mxu1 %v5579_v3  ;;  %3069 = vmatprep.subr.bf16.mxu0 %v5590_v7  ;;  %v5649_v4 = vld [vmem:[%s6466_s15 + $0x24] ss:$8 sps:$4 sm:$0xff]   ;;  %v5652_v7 = vld [vmem:[%s6466_s15 + $0x14] ss:$8 sps:$4 sm:$0xff]   ;;  %s6984_s26 = scalar_lea.vmem %s7121_s23, %s5001_s2 }
 0x1e2   : > { %3042 = vmatprep.subr.bf16.mxu1 %v5587_v6 }
 0x1e4   : > { %3070 = vmatpush1.bf16.msra.mxu0 %v5588_v9  ;;  %v5653_v9 = vld [vmem:[%s6466_s15] ss:$8 sps:$4 sm:$0xff]  }
 0x1e5   : > { %3043 = vmatpush2.bf16.msra.mxu1 %v5585_v8  ;;  %3071 = vmatprep.subr.bf16.mxu0 %v5596_v11  ;;  %v5650_v8 = vld [vmem:[%s6466_s15 + $0x10] ss:$8 sps:$4 sm:$0xff]   ;;  %v5658_v11 = vld [vmem:[%s6466_s15 + $0xf4] ss:$8 sps:$4 sm:$0xff]  }
 0x1e6   : > { %3044 = vmatprep.subr.bf16.mxu1 %v5593_v10  ;;  %v5655_v10 = vld [vmem:[%s6466_s15 + $0x4] ss:$8 sps:$4 sm:$0xff]  }
 0x1e8   : > { %3072 = vmatpush1.bf16.msra.mxu0 %v5594_v13  ;;  %v5661_v13 = vld [vmem:[%s6466_s15 + $0x174] ss:$8 sps:$4 sm:$0xff]  }
 0x1e9   : > { %3045 = vmatpush2.bf16.msra.mxu1 %v5591_v12  ;;  %3073 = vmatprep.subr.bf16.mxu0 %v5602_v15  ;;  %v5659_v12 = vld [vmem:[%s6466_s15 + $0x170] ss:$8 sps:$4 sm:$0xff]  }
 0x1ea   : > { %3046 = vmatprep.subr.bf16.mxu1 %v5599_v14  ;;  %v5667_v14 = vld [vmem:[%s6466_s15 + $0x164] ss:$8 sps:$4 sm:$0xff]   ;;  %v5656_v15 = vld [vmem:[%s6466_s15 + $0xf0] ss:$8 sps:$4 sm:$0xff]  }
 0x1ec   : > { %3074 = vmatpush1.bf16.msra.mxu0 %v5600_v17  ;;  %v5664_v17 = vld [vmem:[%s6466_s15 + $0xe4] ss:$8 sps:$4 sm:$0xff]  }
 0x1ed   : > { %3047 = vmatpush2.bf16.msra.mxu1 %v5597_v16  ;;  %3075 = vmatprep.subr.bf16.mxu0 %v5608_v18  ;;  %v5665_v16 = vld [vmem:[%s6466_s15 + $0x160] ss:$8 sps:$4 sm:$0xff]  }
 0x1ee   : > { %3048 = vmatprep.subr.bf16.mxu1 %v5605_v49  ;;  %v5673_v49 = vld [vmem:[%s6466_s15 + $0x154] ss:$8 sps:$4 sm:$0xff]   ;;  %v5662_v18 = vld [vmem:[%s6466_s15 + $0xe0] ss:$8 sps:$4 sm:$0xff]  }
 0x1f0   : > { %3076 = vmatpush1.bf16.msra.mxu0 %v5606_v21  ;;  %v5670_v21 = vld [vmem:[%s6466_s15 + $0xd4] ss:$8 sps:$4 sm:$0xff]  }
 0x1f1   : > { %3049 = vmatpush2.bf16.msra.mxu1 %v5603_v20  ;;  %3077 = vmatprep.subr.bf16.mxu0 %v5614_v23  ;;  %v5671_v20 = vld [vmem:[%s6466_s15 + $0x150] ss:$8 sps:$4 sm:$0xff]  }
 0x1f2   : > { %3050 = vmatprep.subr.bf16.mxu1 %v5611_v22  ;;  %v5679_v22 = vld [vmem:[%s6466_s15 + $0x144] ss:$8 sps:$4 sm:$0xff]   ;;  %v5668_v23 = vld [vmem:[%s6466_s15 + $0xd0] ss:$8 sps:$4 sm:$0xff]  }
 0x1f4   : > { %3078 = vmatpush1.bf16.msra.mxu0 %v5612_v25  ;;  %v5676_v25 = vld [vmem:[%s6466_s15 + $0xc4] ss:$8 sps:$4 sm:$0xff]  }
 0x1f5   : > { %3051 = vmatpush2.bf16.msra.mxu1 %v5609_v24  ;;  %3079 = vmatprep.subr.bf16.mxu0 %v5620_v28  ;;  %v5677_v24 = vld [vmem:[%s6466_s15 + $0x140] ss:$8 sps:$4 sm:$0xff]  }
 0x1f6   : > { %3052 = vmatprep.subr.bf16.mxu1 %v5617_v27  ;;  %v5685_v27 = vld [vmem:[%s6466_s15 + $0x134] ss:$8 sps:$4 sm:$0xff]   ;;  %v5674_v28 = vld [vmem:[%s6466_s15 + $0xc0] ss:$8 sps:$4 sm:$0xff]  }
 0x1f8   : > { %3080 = vmatpush1.bf16.msra.mxu0 %v5618_v30 }
 0x1f9   : > { %3053 = vmatpush2.bf16.msra.mxu1 %v5615_v29  ;;  %3081 = vmatprep.subr.bf16.mxu0 %v5626_v33  ;;  %v5683_v29 = vld [vmem:[%s6466_s15 + $0x130] ss:$8 sps:$4 sm:$0xff]  }
 0x1fa   : > { %3054 = vmatprep.subr.bf16.mxu1 %v5623_v31  ;;  %v5682_v31 = vld [vmem:[%s6466_s15 + $0xb4] ss:$8 sps:$4 sm:$0xff]  }
 0x1fb   : > { %v2773_v41 = vpop.f32.mrf.mxu0 }
 0x1fc   : > { %v2732_v40 = vpop.f32.mrf.mxu1  ;;  %3082 = vmatpush1.bf16.msra.mxu0 %v5624_v36 }
 0x1fd   : > { %v6857_v42 = vadd.f32 %v2773_v41, %v2732_v40  ;;  %3055 = vmatpush2.bf16.msra.mxu1 %v5621_v35  ;;  %v2775_v46 = vpop.f32.mrf.mxu0  ;;  %4870 = vmatprep.subr.msk.bf16.mxu0 %vm2579_vm0, %v4859_v38  ;;  %v5688_v41 = vld [vmem:[%s6466_s15 + $0xa4] ss:$8 sps:$4 sm:$0xff]  }
 0x1fe   : > { %v2734_v44 = vpop.f32.mrf.mxu1  ;;  %3056 = vmatprep.subr.bf16.mxu1 %v5629_v37  ;;  %v5680_v37 = vld [vmem:[%s6466_s15 + $0xb0] ss:$8 sps:$4 sm:$0xff]  }
 0x1ff   : > { %v6862_v47 = vadd.f32 %v2775_v46, %v2734_v44  ;;  %v2777_v50 = vpop.f32.mrf.mxu0  ;;  %v5691_v44 = vld [vmem:[%s6466_s15 + $0x124] ss:$8 sps:$4 sm:$0xff]   ;;  %v5689_v46 = vld [vmem:[%s6466_s15 + $0x120] ss:$8 sps:$4 sm:$0xff]  }
 0x200   : > { %v2736_v48 = vpop.f32.mrf.mxu1  ;;  %3098 = vmatpush2.bf16.msra.mxu0 %v2611_v45  ;;  %v5694_v45 = vld [vmem:[%s6466_s15 + $0x94] ss:$8 sps:$4 sm:$0xff]  }
 0x201   : > { %v3108_v51 = vmax.f32 %v6813_v59, %v6862_v47  ;;  %3057 = vmatpush2.bf16.msra.mxu1 %v5627_v43  ;;  %v2778_v53 = vpop.f32.mrf.mxu0  ;;  %3443 = vmatprep.subr.bf16.mxu0 %v5634_v56  ;;  %v5686_v43 = vld [vmem:[%s6466_s15 + $0xa0] ss:$8 sps:$4 sm:$0xff]   ;;  %v5692_v48 = vld [vmem:[%s6466_s15 + $0x90] ss:$8 sps:$4 sm:$0xff]   ;;  %v5697_v50 = vld [vmem:[%s6466_s15 + $0x114] ss:$8 sps:$4 sm:$0xff]  }
 0x202   : > { %v2737_v52 = vpop.f32.mrf.mxu1  ;;  %3484 = vmatprep.subr.bf16.mxu1 %v5661_v13  ;;  %v5700_v53 = vld [vmem:[%s6466_s15 + $0x84] ss:$8 sps:$4 sm:$0xff]  }
 0x203   : > { %3100 = vmatmul.mubr.bf16.vlgmr.msra.gmra.mxu0 %v6552_v54  ;;  %v5695_v52 = vld [vmem:[%s6466_s15 + $0x110] ss:$8 sps:$4 sm:$0xff]   ;;  %v5703_v56 = vld [vmem:[%s6466_s15 + $0x104] ss:$8 sps:$4 sm:$0xff]  }
 0x204   : > { %3059 = vmatmul.mubr.bf16.vlgmr.msra.gmra.mxu1 %v6586_v19  ;;  %3444 = vmatpush1.bf16.msra.mxu0 %v5632_v55  ;;  %v5641_v19 = vld [vmem:[%s6466_s15 + $0x40] ss:$8 sps:$4 sm:$0xff]  }
 0x205   : > { %3445 = vmatprep.subr.bf16.mxu0 %v5637_v57  ;;  %3485 = vmatpush1.bf16.msra.mxu1 %v5659_v12  ;;  %v5698_v55 = vld [vmem:[%s6466_s15 + $0x80] ss:$8 sps:$4 sm:$0xff]  }
 0x206   : > { %3486 = vmatprep.subr.bf16.mxu1 %v5667_v14  ;;  %v5701_v57 = vld [vmem:[%s6466_s15 + $0x100] ss:$8 sps:$4 sm:$0xff]   ;;  %s7122_s15 = sld [smem:[#allocation39_spill]] }
 0x208   : > { %3446 = vmatpush1.bf16.msra.mxu0 %v5635_v58  ;;  %v6178_v58 = vmov 0  }
 0x209   : > { %3447 = vmatprep.subr.bf16.mxu0 %v5640_v60  ;;  %3487 = vmatpush1.bf16.msra.mxu1 %v5665_v16  ;;  %v5706_v60 = vld [vmem:[%s6475_s19 + $0x74] ss:$8 sps:$4 sm:$0xff]  }
 0x20a   : > { %3488 = vmatprep.subr.bf16.mxu1 %v5673_v49  ;;  %3516 = vmatprep.mubr.bf16.mxu1 %v6178_v58  ;;  %v3117_v49 = vld [vmem:[%s6458_s25] sm:$0x7]  ;;  %s5002_s25 = sshll.u32 %s6978_s16, 4 }
 0x20c   : > { %3448 = vmatpush1.bf16.msra.mxu0 %v5638_v61  ;;  %s782_s9 = scalar_lea.vmem %s7122_s15, %s5002_s25 }
 0x20d   : > { %3449 = vmatprep.subr.bf16.mxu0 %v5643_v62  ;;  %3489 = vmatpush1.bf16.msra.mxu1 %v5671_v20 }
 0x20e   : > { %3490 = vmatprep.subr.bf16.mxu1 %v5679_v22 }
 0x210   : > { %3450 = vmatpush1.bf16.msra.mxu0 %v5641_v19 }
 0x211   : > { %3451 = vmatprep.subr.bf16.mxu0 %v5646_v63  ;;  %3491 = vmatpush1.bf16.msra.mxu1 %v5677_v24  ;;  %v3129_v24 = vsub.s32 2, %v6514_v26 }
 0x212   : > { %3492 = vmatprep.subr.bf16.mxu1 %v5685_v27 }
 0x214   : > { %3452 = vmatpush1.bf16.msra.mxu0 %v5644_v0 }
 0x215   : > { %3453 = vmatprep.subr.bf16.mxu0 %v5649_v4  ;;  %3493 = vmatpush1.bf16.msra.mxu1 %v5683_v29 }
 0x216   : > { %3494 = vmatprep.subr.bf16.mxu1 %v5691_v44 }
 0x218   : > { %3454 = vmatpush1.bf16.msra.mxu0 %v5647_v5 }
 0x219   : > { %3455 = vmatprep.subr.bf16.mxu0 %v5652_v7  ;;  %3495 = vmatpush1.bf16.msra.mxu1 %v5689_v46 }
 0x21a   : > { %3496 = vmatprep.subr.bf16.mxu1 %v5697_v50 }
 0x21c   : > { %3456 = vmatpush1.bf16.msra.mxu0 %v5650_v8 }
 0x21d   : > { %3457 = vmatprep.subr.bf16.mxu0 %v5655_v10  ;;  %3497 = vmatpush1.bf16.msra.mxu1 %v5695_v52  ;;  %v5709_v52 = vld [vmem:[%s6475_s19 + $0x64] ss:$8 sps:$4 sm:$0xff]  }
 0x21e   : > { %3498 = vmatprep.subr.bf16.mxu1 %v5703_v56  ;;  %v5718_v56 = vld [vmem:[%s6475_s19 + $0x34] ss:$8 sps:$4 sm:$0xff]  }
 0x220   : > { %v2855_v54 = vpop.f32.mrf.mxu1  ;;  %3458 = vmatpush1.bf16.msra.mxu0 %v5653_v9 }
 0x221   : > { %3459 = vmatprep.subr.bf16.mxu0 %v5658_v11  ;;  %3499 = vmatpush1.bf16.msra.mxu1 %v5701_v57  ;;  %v5716_v57 = vld [vmem:[%s6475_s19 + $0x30] ss:$8 sps:$4 sm:$0xff]  }
 0x222   : > { %v2857_v2 = vpop.f32.mrf.mxu1  ;;  %3733 = vmatprep.subr.bf16.mxu1 %v5706_v60  ;;  %v5721_v60 = vld [vmem:[%s6475_s19 + $0x24] ss:$8 sps:$4 sm:$0xff]  }
 0x224   : > { %v2859_v3 = vpop.f32.mrf.mxu1  ;;  %3460 = vmatpush2.bf16.msra.mxu0 %v5656_v15 }
 0x225   : > { %3461 = vmatprep.subr.bf16.mxu0 %v5664_v17  ;;  %v6930_v17 = vsub.s32 0, %v6514_v26 }
 0x226   : > { %v2860_v6 = vpop.f32.mrf.mxu1 }
 0x227   : > { %v3122_v20 = vrot.slane %v3117_v49, %v6930_v17 }
 0x228   : > { %3462 = vmatpush2.bf16.msra.mxu0 %v5662_v18  ;;  %v6934_v18 = vsub.s32 1, %v6514_v26 }
 0x229   : > { %3463 = vmatprep.subr.bf16.mxu0 %v5670_v21 }
 0x22a   : > { %v3126_v47 = vrot.slane %v3117_v49, %v6934_v18 }
 0x22c   : > { %3464 = vmatpush2.bf16.msra.mxu0 %v5668_v23 }
 0x22d   : > { %3465 = vmatprep.subr.bf16.mxu0 %v5676_v25 }
 0x230   : > { %3466 = vmatpush2.bf16.msra.mxu0 %v5674_v28 }
 0x231   : > { %3467 = vmatprep.subr.bf16.mxu0 %v5682_v31 }
 0x234   : > { %3468 = vmatpush2.bf16.msra.mxu0 %v5680_v37 }
 0x235   : > { %3469 = vmatprep.subr.bf16.mxu0 %v5688_v41 }
 0x238   : > { %3470 = vmatpush2.bf16.msra.mxu0 %v5686_v43 }
 0x239   : > { %3471 = vmatprep.subr.bf16.mxu0 %v5694_v45 }
 0x23b   : > { %v2814_v30 = vpop.f32.mrf.mxu0 }
 0x23c   : > { %v6903_v33 = vadd.f32 %v2855_v54, %v2814_v30  ;;  %3472 = vmatpush2.bf16.msra.mxu0 %v5692_v48 }
 0x23d   : > { %v2816_v34 = vpop.f32.mrf.mxu0  ;;  %3473 = vmatprep.subr.bf16.mxu0 %v5700_v53  ;;  %v5715_v53 = vld [vmem:[%s6475_s19 + $0x44] ss:$8 sps:$4 sm:$0xff]  }
 0x23e   : > { %v3109_v35 = vmax.f32 %v6820_v1, %v6903_v33  ;;  %v6907_v36 = vadd.f32 %v2857_v2, %v2816_v34 }
 0x23f   : > { %v2818_v38 = vpop.f32.mrf.mxu0 }
 0x240   : > { %v3110_v39 = vmax.f32 %v6857_v42, %v6907_v36  ;;  %3474 = vmatpush2.bf16.msra.mxu0 %v5698_v55  ;;  %v3130_v38 = vrot.slane %v3117_v49, %v3129_v24  ;;  %v5707_v42 = vld [vmem:[%s6475_s19 + $0x60] ss:$8 sps:$4 sm:$0xff]   ;;  %v5712_v36 = vld [vmem:[%s6475_s19 + $0x54] ss:$8 sps:$4 sm:$0xff]  }
 0x241   : > { %v2819_v40 = vpop.f32.mrf.mxu0  ;;  %v5713_v55 = vld [vmem:[%s6475_s19 + $0x40] ss:$8 sps:$4 sm:$0xff]  }
 0x242   : > { %v5752_v49 = vld [vmem:[%s6984_s26 + $0x78] sm:$0xff]   ;;  %v5757_v24 = vld [vmem:[%s6984_s26 + $0x28] sm:$0xff]  }
 0x243   : > { %5003 = vmatprep.subr.bf16.mxu0 %v5752_v49 }
 0x25f   : > { %v2937_v62 = vpop.f32.mrf.mxu0 }
 0x260   : > { %v2896_v61 = vpop.f32.mrf.mxu1 }
 0x261   : > { %v2938_v19 = vadd.f32 %v2937_v62, %v2896_v61  ;;  %v2939_v63 = vpop.f32.mrf.mxu0  ;;  %v5719_v61 = vld [vmem:[%s6475_s19 + $0x20] ss:$8 sps:$4 sm:$0xff]   ;;  %v5724_v62 = vld [vmem:[%s6475_s19 + $0x14] ss:$8 sps:$4 sm:$0xff]  }
 0x262   : > { %v2898_v54 = vpop.f32.mrf.mxu1 }
 0x263   : > { %v2940_v0 = vadd.f32 %v2939_v63, %v2898_v54  ;;  %v2941_v3 = vpop.f32.mrf.mxu0  ;;  %v5727_v54 = vld [vmem:[%s6475_s19 + $0x4] ss:$8 sps:$4 sm:$0xff]   ;;  %v5725_v63 = vld [vmem:[%s6475_s19] ss:$8 sps:$4 sm:$0xff]  }
 0x264   : > { %v2900_v2 = vpop.f32.mrf.mxu1  ;;  %v5733_v3 = vld [vmem:[%s6475_s19 + $0xe4] ss:$8 sps:$4 sm:$0xff]  }
 0x265   : > { %v2942_v5 = vpop.f32.mrf.mxu0  ;;  %v5728_v2 = vld [vmem:[%s6475_s19 + $0xf0] ss:$8 sps:$4 sm:$0xff]  }
 0x266   : > { %v2901_v4 = vpop.f32.mrf.mxu1  ;;  %v5736_v5 = vld [vmem:[%s6475_s19 + $0xd4] ss:$8 sps:$4 sm:$0xff]  }
 0x267   : > { %v5731_v4 = vld [vmem:[%s6475_s19 + $0xe0] ss:$8 sps:$4 sm:$0xff]  }
 0x284   : > { %v3019_v6 = vpop.f32.mrf.mxu1 }
 0x286   : > { %v3021_v7 = vpop.f32.mrf.mxu1 }
 0x288   : > { %v3023_v8 = vpop.f32.mrf.mxu1 }
 0x289   : > { %v5737_v8 = vld [vmem:[%s6475_s19 + $0xc0] ss:$8 sps:$4 sm:$0xff]  }
 0x28a   : > { %v3024_v9 = vpop.f32.mrf.mxu1 }
 0x28b   : > { %v5742_v9 = vld [vmem:[%s6475_s19 + $0xb4] ss:$8 sps:$4 sm:$0xff]  }
 0x29f   : > { %v2978_v10 = vpop.f32.mrf.mxu0 }
 0x2a0   : > { %v3020_v28 = vadd.f32 %v3019_v6, %v2978_v10  ;;  %v5734_v6 = vld [vmem:[%s6475_s19 + $0xd0] ss:$8 sps:$4 sm:$0xff]  }
 0x2a1   : > { %v2980_v11 = vpop.f32.mrf.mxu0  ;;  %v5740_v10 = vld [vmem:[%s6475_s19 + $0xb0] ss:$8 sps:$4 sm:$0xff]  }
 0x2a2   : > { %v3022_v12 = vadd.f32 %v3021_v7, %v2980_v11  ;;  %v5739_v7 = vld [vmem:[%s6475_s19 + $0xc4] ss:$8 sps:$4 sm:$0xff]  }
 0x2a3   : > { %v2982_v13 = vpop.f32.mrf.mxu0  ;;  %v5745_v11 = vld [vmem:[%s6475_s19 + $0xa4] ss:$8 sps:$4 sm:$0xff]  }
 0x2a4   : > { %v3111_v14 = vmax.f32 %v2938_v19, %v3022_v12  ;;  %v5722_v19 = vld [vmem:[%s6475_s19 + $0x10] ss:$8 sps:$4 sm:$0xff]   ;;  %v5743_v12 = vld [vmem:[%s6475_s19 + $0xa0] ss:$8 sps:$4 sm:$0xff]   ;;  %v5748_v13 = vld [vmem:[%s6475_s19 + $0x94] ss:$8 sps:$4 sm:$0xff]  }
 0x2a5   : > { %v2983_v15 = vpop.f32.mrf.mxu0 }
 0x2a6   : > { %v3114_v16 = vmax.f32 %v3108_v51, %v3111_v14  ;;  %v5746_v14 = vld [vmem:[%s6475_s19 + $0x90] ss:$8 sps:$4 sm:$0xff]   ;;  %v5751_v15 = vld [vmem:[%s6475_s19 + $0x84] ss:$8 sps:$4 sm:$0xff]  }
 0x2a8   : > { %v3134_v51 = vadd.f32 %v3122_v20, %v3114_v16  ;;  %v5749_v16 = vld [vmem:[%s6475_s19 + $0x80] ss:$8 sps:$4 sm:$0xff]  }
 0x2a9   : > { %v5753_v20 = vld [vmem:[%s6984_s26 + $0x38] sm:$0xff]  }
 0x2aa   : > { %v3137_v44 = vmax.f32 %v3134_v51, 0.0  ;;  %v3191_v51 = vld [vmem:[%s6468_s13] sm:$0x3] }
 0x2ac   : > { %v3140_v33 = vpack.c.bf16 %v3137_v44, %v3137_v44 }
 0x2c3   : > { %v3101_v22 = vpop.f32.mrf.mxu0 }
 0x2c4   : > { %v3060_v21 = vpop.f32.mrf.mxu1 }
 0x2c5   : > { %v3102_v23 = vadd.f32 %v3101_v22, %v3060_v21  ;;  %v3103_v27 = vpop.f32.mrf.mxu0  ;;  %v5754_v21 = vld [vmem:[%s6984_s26 + $0x70] sm:$0xff]  }
 0x2c6   : > { %v3062_v25 = vpop.f32.mrf.mxu1  ;;  %v5755_v22 = vld [vmem:[%s6984_s26 + $0x30] sm:$0xff]  }
 0x2c7   : > { %v3112_v29 = vmax.f32 %v2940_v0, %v3102_v23  ;;  %v3104_v59 = vadd.f32 %v3103_v27, %v3062_v25  ;;  %v3105_v31 = vpop.f32.mrf.mxu0  ;;  %v5730_v0 = vld [vmem:[%s6475_s19 + $0xf4] ss:$8 sps:$4 sm:$0xff]  }
 0x2c8   : > { %v3064_v30 = vpop.f32.mrf.mxu1  ;;  %v5756_v23 = vld [vmem:[%s6984_s26 + $0x68] sm:$0xff]   ;;  %v5758_v25 = vld [vmem:[%s6984_s26 + $0x60] sm:$0xff]   ;;  %v3200_v31 = vrot.slane %v3191_v51, %v6934_v18 }
 0x2c9   : > { %v3115_v34 = vmax.f32 %v3109_v35, %v3112_v29  ;;  %v3113_v37 = vmax.f32 %v3020_v28, %v3104_v59  ;;  %v3106_v26 = vpop.f32.mrf.mxu0  ;;  %v5704_v35 = vld [vmem:[%s6475_s19 + $0x70] ss:$8 sps:$4 sm:$0xff]   ;;  %v5762_v59 = vld [vmem:[%s6984_s26 + $0x50] sm:$0xff]   ;;  %v3196_v30 = vrot.slane %v3191_v51, %v6930_v17 }
 0x2ca   : > { %v3065_v40 = vpop.f32.mrf.mxu1  ;;  %v5759_v27 = vld [vmem:[%s6984_s26 + $0x20] sm:$0xff]   ;;  %v5760_v28 = vld [vmem:[%s6984_s26 + $0x58] sm:$0xff]  }
 0x2cb   : > { %v3116_v41 = vmax.f32 %v3110_v39, %v3113_v37  ;;  %v3135_v43 = vadd.f32 %v3126_v47, %v3115_v34  ;;  %v5710_v39 = vld [vmem:[%s6475_s19 + $0x50] ss:$8 sps:$4 sm:$0xff]   ;;  %v5763_v47 = vld [vmem:[%s6984_s26 + $0x10] sm:$0xff]  }
 0x2cc   : > { %v5761_v29 = vld [vmem:[%s6984_s26 + $0x18] sm:$0xff]  }
 0x2cd   : > { %v3136_v46 = vadd.f32 %v3130_v38, %v3116_v41  ;;  %v3138_v45 = vmax.f32 %v3135_v43, 0.0 }
 0x2cf   : > { %v3139_v48 = vmax.f32 %v3136_v46, 0.0  ;;  %v3141_v1 = vpack.c.bf16 %v3138_v45, %v3138_v45 }
 0x2d1   : > { %3475 = vmatprep.mubr.bf16.mxu0 %v3141_v1  ;;  %v3142_v50 = vpack.c.bf16 %v3139_v48, %v3139_v48 }
 0x2d2   : > { %3476 = vmatmul.mubr.bf16.vlgmr.msra.gmra.mxu0 %v3140_v33 }
 0x2d3   : > { %3517 = vmatmul.mubr.bf16.vlgmr.msra.gmra.mxu1 %v3142_v50  ;;  %5004 = vmatpush3.bf16.msra.mxu0 %v5753_v20 }
 0x2d4   : > { %3734 = vmatpush1.bf16.msra.mxu1 %v5704_v35  ;;  %5005 = vmatprep.subr.bf16.mxu0 %v5754_v21 }
 0x2d5   : > { %3735 = vmatprep.subr.bf16.mxu1 %v5709_v52 }
 0x2d7   : > { %5006 = vmatpush3.bf16.msra.mxu0 %v5755_v22 }
 0x2d8   : > { %3736 = vmatpush1.bf16.msra.mxu1 %v5707_v42  ;;  %5007 = vmatprep.subr.bf16.mxu0 %v5756_v23  ;;  %v5764_v42 = vld [vmem:[%s6984_s26 + $0x48] sm:$0xff]  }
 0x2d9   : > { %3737 = vmatprep.subr.bf16.mxu1 %v5712_v36  ;;  %v5765_v36 = vld [vmem:[%s6984_s26 + $0x8] sm:$0xff]  }
 0x2db   : > { %5008 = vmatpush3.bf16.msra.mxu0 %v5757_v24 }
 0x2dc   : > { %3738 = vmatpush1.bf16.msra.mxu1 %v5710_v39  ;;  %5009 = vmatprep.subr.bf16.mxu0 %v5758_v25  ;;  %v5766_v39 = vld [vmem:[%s6984_s26 + $0x40] sm:$0xff]  }
 0x2dd   : > { %3739 = vmatprep.subr.bf16.mxu1 %v5715_v53  ;;  %v5767_v53 = vld [vmem:[%s6984_s26] sm:$0xff]  }
 0x2df   : > { %5010 = vmatpush3.bf16.msra.mxu0 %v5759_v27 }
 0x2e0   : > { %3740 = vmatpush1.bf16.msra.mxu1 %v5713_v55  ;;  %5011 = vmatprep.subr.bf16.mxu0 %v5760_v28  ;;  %v3561_v55 = vld [vmem:[%s6477_s1] sm:$0x3] }
 0x2e1   : > { %3741 = vmatprep.subr.bf16.mxu1 %v5718_v56  ;;  %v3566_v56 = vrot.slane %v3561_v55, %v6930_v17 }
 0x2e3   : > { %5012 = vmatpush3.bf16.msra.mxu0 %v5761_v29 }
 0x2e4   : > { %3742 = vmatpush1.bf16.msra.mxu1 %v5716_v57  ;;  %5013 = vmatprep.subr.bf16.mxu0 %v5762_v59  ;;  %v3570_v57 = vrot.slane %v3561_v55, %v6934_v18 }
 0x2e5   : > { %3743 = vmatprep.subr.bf16.mxu1 %v5721_v60 }
 0x2e7   : > { %5014 = vmatpush3.bf16.msra.mxu0 %v5763_v47 }
 0x2e8   : > { %3744 = vmatpush1.bf16.msra.mxu1 %v5719_v61  ;;  %5015 = vmatprep.subr.bf16.mxu0 %v5764_v42 }
 0x2e9   : > { %3745 = vmatprep.subr.bf16.mxu1 %v5724_v62 }
 0x2eb   : > { %5016 = vmatpush3.bf16.msra.mxu0 %v5765_v36 }
 0x2ec   : > { %3746 = vmatpush1.bf16.msra.mxu1 %v5722_v19  ;;  %5017 = vmatprep.subr.bf16.mxu0 %v5766_v39 }
 0x2ed   : > { %3747 = vmatprep.subr.bf16.mxu1 %v5727_v54 }
 0x2ef   : > { %5018 = vmatpush3.bf16.msra.mxu0 %v5767_v53 }
 0x2f0   : > { %3748 = vmatpush1.bf16.msra.mxu1 %v5725_v63 }
 0x2f1   : > { %3749 = vmatprep.subr.bf16.mxu1 %v5730_v0 }
 0x2f4   : > { %3750 = vmatpush2.bf16.msra.mxu1 %v5728_v2 }
 0x2f5   : > { %3751 = vmatprep.subr.bf16.mxu1 %v5733_v3 }
 0x2f8   : > { %3752 = vmatpush2.bf16.msra.mxu1 %v5731_v4 }
 0x2f9   : > { %3753 = vmatprep.subr.bf16.mxu1 %v5736_v5  ;;  %v5768_v5 = vld [vmem:[%s782_s9 + $0x4] ss:$8 sps:$4 sm:$0x1f]  }
 0x2fa   : > { %4971 = vmatprep.subr.msk.bf16.mxu0 %vm3968_vm2, %v5768_v5 }
 0x2fc   : > { %3754 = vmatpush2.bf16.msra.mxu1 %v5734_v6  ;;  %v5770_v6 = vld [vmem:[%s782_s9] ss:$8 sps:$4 sm:$0x1f]  }
 0x2fd   : > { %3755 = vmatprep.subr.bf16.mxu1 %v5739_v7  ;;  %v3970_v7 = vsel %vm3968_vm2, %v5770_v6, 0 }
 0x300   : > { %3756 = vmatpush2.bf16.msra.mxu1 %v5737_v8 }
 0x301   : > { %3757 = vmatprep.subr.bf16.mxu1 %v5742_v9  ;;  %v4952_v9 = vld [vmem:[%s674_s4] ss:$0 sm:$0xff] }
 0x304   : > { %3758 = vmatpush2.bf16.msra.mxu1 %v5740_v10 }
 0x305   : > { %3759 = vmatprep.subr.bf16.mxu1 %v5745_v11 }
 0x308   : > { %3760 = vmatpush2.bf16.msra.mxu1 %v5743_v12 }
 0x309   : > { %3761 = vmatprep.subr.bf16.mxu1 %v5748_v13 }
 0x30c   : > { %3762 = vmatpush2.bf16.msra.mxu1 %v5746_v14 }
 0x30d   : > { %3763 = vmatprep.subr.bf16.mxu1 %v5751_v15 }
 0x310   : > { %3764 = vmatpush2.bf16.msra.mxu1 %v5749_v16 }
 0x392   : > { %v3477_v34 = vpop.f32.mrf.mxu0 }
 0x393   : > { %v3478_v37 = vadd.f32 %v3477_v34, %v3196_v30  ;;  %v3518_v38 = vpop.f32.mrf.mxu1 }
 0x394   : > { %v3479_v40 = vpop.f32.mrf.mxu0 }
 0x395   : > { %v3519_v26 = vadd.f32 %v3518_v38, %v3478_v37  ;;  %v3480_v41 = vadd.f32 %v3479_v40, %v3200_v31  ;;  %v3520_v43 = vpop.f32.mrf.mxu1 }
 0x396   : > { %v3481_v44 = vpop.f32.mrf.mxu0 }
 0x397   : > { %v3521_v46 = vadd.f32 %v3520_v43, %v3480_v41  ;;  %v3522_v45 = vpop.f32.mrf.mxu1  ;;  %v3525_v48 = vmax.f32 %v3519_v26, 0.0 }
 0x398   : > { %v3482_v1 = vpop.f32.mrf.mxu0 }
 0x399   : > { %v3526_v33 = vmax.f32 %v3521_v46, 0.0  ;;  %v3523_v35 = vpop.f32.mrf.mxu1  ;;  %v3527_v52 = vpack.c.bf16 %v3525_v48, %v3525_v48 }
 0x39b   : > { %v3528_v50 = vpack.c.bf16 %v3526_v33, %v3526_v33 }
 0x39d   : > { %3765 = vmatprep.mubr.bf16.mxu1 %v3528_v50 }
 0x39e   : > { %3766 = vmatmul.mubr.bf16.vlgmr.msra.gmra.mxu1 %v3527_v52 }
 0x45e   : > { %v3767_v60 = vpop.f32.mrf.mxu1 }
 0x45f   : > { %v3768_v61 = vadd.f32 %v3767_v60, %v3566_v56 }
 0x460   : > { %v3769_v62 = vpop.f32.mrf.mxu1 }
 0x461   : > { %v3770_v19 = vadd.f32 %v3769_v62, %v3570_v57  ;;  %v3774_v54 = vmax.f32 %v3768_v61, 0.0 }
 0x462   : > { %v3771_v63 = vpop.f32.mrf.mxu1 }
 0x463   : > { %v3775_v0 = vmax.f32 %v3770_v19, 0.0  ;;  %v3776_v4 = vpack.c.bf16 %v3774_v54, %v3774_v54 }
 0x464   : > { %v3772_v2 = vpop.f32.mrf.mxu1 }
 0x465   : > { %v3777_v3 = vpack.c.bf16 %v3775_v0, %v3775_v0 }
 0x467   : > { %3945 = vmatprep.mubr.bf16.mxu0 %v3777_v3 }
 0x468   : > { %3946 = vmatmul.mubr.bf16.vlgmr.msra.gmra.mxu0 %v3776_v4 }
 0x469   : > { %4007 = vmatprep.mubr.bf16.mxu0 %v6178_v58  ;;  %3990 = vmatpush1.bf16.msra.mxu0 %v3970_v7 }
 0x528   : > { %v5019_v8 = vpop.f32.mrf.mxu0 }
 0x52a   : > { %v5020_v10 = vpop.f32.mrf.mxu0 }
 0x52b   : > { %v5021_v11 = vadd.f32 %v5020_v10, %v5019_v8 }
 0x52c   : > { %v5022_v12 = vpop.f32.mrf.mxu0 }
 0x52d   : > { %v3948_v13 = vadd.f32 %v5021_v11, %v4952_v9 }
 0x52e   : > { %v5023_v14 = vpop.f32.mrf.mxu0 }
 0x52f   : > { %v3953_v58 = vpack.c.bf16 %v3948_v13, %v3948_v13 }
 0x531   : > { %4972 = vmatmul.mubr.msk.bf16.vlgmr.msra.gmra.mxu0 %vm3964_vm3, %v3953_v58 }
 0x5f1   : > { %v4009_v15 = vpop.f32.mrf.mxu0 }
 0x5f3   : > { %v4011_v16 = vpop.f32.mrf.mxu0  ;;  %4019 = sbr.rel (%p4973_p7) target bundleno = 1531 (0x5fb), region = 116 }
 0x5f5   : > { %v4013_v49 = vpop.f32.mrf.mxu0 }
 0x5f7   : > { %v4014_v20 = vpop.f32.mrf.mxu0 }
 0x5f8   : > { %v4022_v21 = vcombine.low %v4009_v15, %v4011_v16 }
 0x5fa   : > { %4974 = vst.sshfl [vmem:[#allocation2] sm:$0x33 pattern:$0x76325410] %v4022_v21 }
 0x5fb PF: > { %s7123_s30 = sld [smem:[#allocation29_spill]] }
 0x601   : > { %p4975_p9 = scmp.le.s32.totalorder %s7123_s30, 0 }
 0x603   : > { %4035 = sbr.rel (%p4975_p9) target bundleno = 1551 (0x60f), region = 120 }
 0x608   : > { %v4039_v22 = vcombine.low %v4009_v15, %v4011_v16  ;;  %v4036_v23 = vld [vmem:[#allocation2] sm:$0xf] }
 0x60a   : > { %v4046_v24 = vrot.slane %v4039_v22, %v6522_v32 }
 0x60c   : > { %v4048_v25 = vadd.f32 %v4046_v24, %v4036_v23 }
 0x60e   : > { %4049 = vst [vmem:[#allocation2] sm:$0xf] %v4048_v25 }
 0x60f PF: > { %s7124_s13 = sld [smem:[#allocation29_spill]] }
 0x615   : > { %p4976_p4 = scmp.ne.s32.totalorder %s7124_s13, 1 }
 0x617   : > { %4053 = sbr.rel (%p4976_p4) target bundleno = 1797 (0x705), region = 124 }
 0x61c   : > { %v5771_v27 = vld [vmem:[#allocation17 + $0x78] sm:$0xff]   ;;  %v5773_v29 = vld [vmem:[#allocation17 + $0x70] sm:$0xff]   ;;  %v5775_v47 = vld [vmem:[#allocation17 + $0x68] sm:$0xff]  }
 0x61d   : > { %v5772_v28 = vld [vmem:[#allocation17 + $0x38] sm:$0xff]   ;;  %5025 = vmatprep.subr.bf16.mxu0 %v5771_v27  ;;  %v5774_v59 = vld [vmem:[#allocation17 + $0x30] sm:$0xff]   ;;  %v5776_v51 = vld [vmem:[#allocation17 + $0x28] sm:$0xff]  }
 0x61e   : > { %5026 = vmatpush3.bf16.msra.mxu0 %v5772_v28  ;;  %v5777_v30 = vld [vmem:[#allocation17 + $0x60] sm:$0xff]   ;;  %v5779_v34 = vld [vmem:[#allocation17 + $0x58] sm:$0xff]   ;;  %v5781_v38 = vld [vmem:[#allocation17 + $0x50] sm:$0xff]  }
 0x61f   : > { %5027 = vmatprep.subr.bf16.mxu0 %v5773_v29  ;;  %v5778_v31 = vld [vmem:[#allocation17 + $0x20] sm:$0xff]   ;;  %v5780_v37 = vld [vmem:[#allocation17 + $0x18] sm:$0xff]   ;;  %v5782_v43 = vld [vmem:[#allocation17 + $0x10] sm:$0xff]  }
 0x620   : > { %v4055_v40 = vld [vmem:[#allocation15] sm:$0x3]  ;;  %v5783_v46 = vld [vmem:[#allocation17 + $0x48] sm:$0xff]   ;;  %v5785_v35 = vld [vmem:[#allocation17 + $0x40] sm:$0xff]  }
 0x621   : > { %v4060_v26 = vrot.slane %v4055_v40, %v6930_v17  ;;  %v4064_v41 = vrot.slane %v4055_v40, %v6934_v18  ;;  %v4054_v45 = vld [vmem:[#allocation2] sm:$0xf]  ;;  %v5786_v52 = vld [vmem:[#allocation17] sm:$0xff]  }
 0x622   : > { %5028 = vmatpush3.bf16.msra.mxu0 %v5774_v59  ;;  %v5784_v1 = vld [vmem:[#allocation17 + $0x8] sm:$0xff]   ;;  %v4977_v53 = vld [vmem:[#allocation18] ss:$0 sm:$0xff] }
 0x623   : > { %5029 = vmatprep.subr.bf16.mxu0 %v5775_v47  ;;  %v4065_v44 = vcombine.low %v4060_v26, %v4064_v41 }
 0x625   : > { %v4072_v48 = vrot.slane %v4065_v44, %v6522_v32 }
 0x626   : > { %5030 = vmatpush3.bf16.msra.mxu0 %v5776_v51 }
 0x627   : > { %5031 = vmatprep.subr.bf16.mxu0 %v5777_v30  ;;  %v4074_v33 = vadd.f32 %v4072_v48, %v4054_v45 }
 0x629   : > { %v4075_v50 = vmax.f32 %v4074_v33, 0.0 }
 0x62a   : > { %5032 = vmatpush3.bf16.msra.mxu0 %v5778_v31 }
 0x62b   : > { %5033 = vmatprep.subr.bf16.mxu0 %v5779_v34  ;;  %v4083_v17 = vrot.slane %v4075_v50, %v6522_v32 }
 0x62d   : > { %v4084_v18 = vcombine.high %v4083_v17, %v4083_v17  ;;  %v4087_v42 = vpack.c.bf16 %v4083_v17, %v4083_v17 }
 0x62e   : > { %5034 = vmatpush3.bf16.msra.mxu0 %v5780_v37 }
 0x62f   : > { %5035 = vmatprep.subr.bf16.mxu0 %v5781_v38  ;;  %v4088_v36 = vpack.c.bf16 %v4084_v18, %v4084_v18 }
 0x631   : > { %4256 = vmatprep.mubr.bf16.mxu0 %v4088_v36 }
 0x632   : > { %5036 = vmatpush3.bf16.msra.mxu0 %v5782_v43 }
 0x633   : > { %5037 = vmatprep.subr.bf16.mxu0 %v5783_v46 }
 0x636   : > { %5038 = vmatpush3.bf16.msra.mxu0 %v5784_v1 }
 0x637   : > { %5039 = vmatprep.subr.bf16.mxu0 %v5785_v35 }
 0x63a   : > { %5040 = vmatpush3.bf16.msra.mxu0 %v5786_v52 }
 0x63d   : > { %4257 = vmatmul.mubr.bf16.vlgmr.msra.gmra.mxu0 %v4087_v42 }
 0x6fd   : > { %v5041_v39 = vpop.f32.mrf.mxu0 }
 0x6ff   : > { %v5042_v55 = vpop.f32.mrf.mxu0 }
 0x700   : > { %v5043_v56 = vadd.f32 %v5042_v55, %v5041_v39 }
 0x701   : > { %v5044_v57 = vpop.f32.mrf.mxu0 }
 0x702   : > { %v4259_v60 = vadd.f32 %v5043_v56, %v4977_v53 }
 0x703   : > { %v5045_v61 = vpop.f32.mrf.mxu0 }
 0x704   : > { %4264 = vst [vmem:[#allocation20] sm:$0x3] %v4259_v60 }
 0x705 PF: > { %s7125_s7 = sld [smem:[#allocation31_spill]]  ;;  %s6179_s19 = smov [#allocation20]  }
 0x706   : > { %s4274_s14 = sshll.u32 %s6179_s19, 4  ;;  %s4275_s14 = int_to_ptr.vmem [resolvable:$true] %s4274_s14 }
 0x707   : > { %s6061_s1 = scalar_lea.vmem %s4275_s14, 32  ;;  %p6068_p6 = scmp.lt.s32.totalorder %s4275_s14, %s4275_s14 }
 0x708   : > { %p6062_p0 = scmp.ne.s32.totalorder %s4275_s14, %s6061_s1  ;;  %p6069_p10 = scmp.lt.s32.totalorder %s6061_s1, %s6061_s1 }
 0x70a   : > { %p6070_p12 = por %p6069_p10, %p6068_p6 }
 0x70b   : > { %p5125_p13 = scmp.eq.s32.totalorder %s7125_s7, 1 }
 0x70d   : > { %p6063_p2 = pnand %p6062_p0, %p5125_p13 }
 0x70f   : > { %p6064_p1 = pneg %p6063_p2 }
 0x711   : > { %p6071_p11 = pnand %p6070_p12, %p6064_p1 }
 0x713   : > { %6074 = shalt.err (!%p6071_p11)
}
 0x714   : > { %s7126_s10 = sld [smem:[#allocation41_spill]] }
 0x71a   : > { %5083 = dma.vmem_to_hbm [thread:$0]  (%p5125_p13), %s4275_s14, 32, %s7126_s10, [#allocation5]  }
 0x71b   : > { %6134 = dma.done.wait (%p5125_p13), [#allocation5], 32  }
 0x71c   : > { %6136 = vsyncadd (%p5125_p13), [#allocation5], 4294967264 }
 0x71d PF: > { %s7127_s28 = sld [smem:[#allocation30_spill]]  ;;  %s7130_s26 = smov %s6147_s27 }
 0x71e   : > { %s7128_s25 = sld [smem:[#allocation28_spill]]  ;;  %s7131_s27 = smov %s6360_s24 }
 0x71f   : > { %s7129_s18 = sld [smem:[#allocation33_spill]] }
 0x723   : > { %s38_s30 = sadd.s32 1, %s7127_s28   ;;  %s7132_s28 = smov %s6155_s29 }
 0x724   : > { %p35_p8 = scmp.ge.s32.totalorder %s38_s30, 4  }
 0x725   : > { %s7133_s29 = smov %s7129_s18 }
 0x726   :  { %37 = sbr.rel (!%p35_p8) target bundleno = 22 (0x16), region = 215 }
 0x72b   :  { %4287 = vsyncpa [#allocation4], 1 }
 0x72c   :  { %4289 = vsyncpa [#allocation4 + $0x1], 1 }
 0x72d   :  { %4290 = vsyncpa [#allocation7], 1 }
 0x72e   :  { %4292 = vsyncpa [#allocation7 + $0x1], 1 }
 0x72f   :  { %4293 = vsyncpa [#allocation10], 1 }
 0x730   :  { %4295 = vsyncpa [#allocation10 + $0x1], 1 }
 0x731   :  { %4296 = vsyncpa [#allocation13], 1 }
 0x732   :  { %4298 = vsyncpa [#allocation13 + $0x1], 1 }
 0x733   :  { %4299 = vsyncpa [#allocation16], 1 }
 0x734   :  { %4300 = vsyncpa [#allocation19], 1 }
 0x735   :  { %4301 = vsyncpa [#allocation5], 1 }
 0x736   :  { %4303 = vsyncpa [#allocation5 + $0x1], 1 }

</bundles_post_ra>
